<compile_context>
chip_gen: v6e
topology: v6e:2x2x1
jax: 0.10.0
libtpu: 0.0.40
codegen_flags: <defaults>
</compile_context>

<pallas_src>
import functools

import numpy as np
import jax
import jax.numpy as jnp
from jax import lax
from jax.experimental import pallas as pl
from jax.experimental.pallas import tpu as pltpu

KH = KW = 3          # 3x3 conv, stride 1, padding 1 -> feature map keeps (H, W)
EPS = 1e-7
BLOCK_B = 8          # samples per grid step


def cam_loss_kernel(x_ref, wbd_ref, bias_ref, s_ref, tapmask_ref, nm_ref,
                    sq_ref, lin_ref, mn_ref, mx_ref, *, tap_offsets):
    """Fused GradCAM + masked-loss partials for one block of B samples.

    x_ref      : (B*C, HW)      bf16  pixels, rows = (sample, channel)
    wbd_ref    : (9, F*B, B*C)  f32   block-diagonal conv weights per 3x3 tap
                                      (output rows are channel-major: f*B + b)
    bias_ref   : (F*B, 1)       f32   conv bias, repeated per sample
    s_ref      : (F*B, 1)       f32   sum_over_classes(fc_w) / HW^2, repeated
    tapmask_ref: (9, HW)        f32   validity mask of each tap ('SAME' pad)
    nm_ref     : (B, HW)        f32   ~seg_mask for this sample block
    outputs    : (B, 1) f32: sum(nm*cam^2), sum(nm*cam), min(cam), max(cam)
    """
    x32 = x_ref[...].astype(jnp.float32)          # (B*C, HW)
    tapmasks = tapmask_ref[...]                   # (9, HW)
    hw = x32.shape[-1]
    fb = bias_ref.shape[0]                        # F*B
    b = nm_ref.shape[0]                           # B
    f = fb // b                                   # F

    acc = jnp.zeros((fb, hw), jnp.float32)
    for k, off in enumerate(tap_offsets):         # 9 taps, unrolled at trace time
        if off == 0:
            shifted = x32
        else:
            # shifted[i] = x32[(i + off) % hw]; the wrapped / out-of-row lanes
            # are exactly the lanes tapmask zeroes out ('SAME' padding).
            shifted = pltpu.roll(x32, shift=(-off) % hw, axis=1)
        masked = shifted * tapmasks[k:k + 1, :]
        acc = acc + jnp.dot(wbd_ref[k], masked,
                            preferred_element_type=jnp.float32)
    A = acc + bias_ref[...]                       # (F*B, HW) conv activations

    # GradCAM for ClassifierOutputAllTargets through relu -> GAP -> fc:
    #   d(sum of logits)/dA[f,hw] = s_f * 1{A>0} / HW ; channel weight is the
    #   spatial mean of that gradient (1/HW^2 folded into s_ref).
    pos = (A > 0.0).astype(jnp.float32)
    w = s_ref[...] * jnp.sum(pos, axis=1, keepdims=True)     # (F*B, 1)
    weighted = w * A                                          # (F*B, HW)

    # Per-sample channel sum: rows are f*B + b, so slab j is samples 0..B-1 at
    # channel j -> sum F sublane-aligned (B, HW) slabs (exact f32 adds).
    cam = weighted[0:b, :]
    for j in range(1, f):
        cam = cam + weighted[j * b:(j + 1) * b, :]
    cam = jnp.maximum(cam, 0.0)                               # (B, HW)

    nm = nm_ref[...]                                          # (B, HW) ~seg_mask
    mc = nm * cam
    sq_ref[...] = jnp.sum(mc * cam, axis=1, keepdims=True)
    lin_ref[...] = jnp.sum(mc, axis=1, keepdims=True)
    mn_ref[...] = jnp.min(cam, axis=1, keepdims=True)
    mx_ref[...] = jnp.max(cam, axis=1, keepdims=True)


def view_gradcam_loss(X, seg_mask_np, has_seg_mask_np, params, *, block_b=BLOCK_B):
    """Forward of ViewGradCAMLoss (default hparams). Masks are host numpy bools."""
    N_total, C, H, W = X.shape
    if not has_seg_mask_np.any():
        return jnp.asarray(0.0, jnp.float32)

    HW = H * W
    idx = np.nonzero(has_seg_mask_np)[0]          # host-side boolean filtering
    Nf = int(idx.shape[0])
    n_pad = (-Nf) % block_b
    Nf_pad = Nf + n_pad
    n_blocks = Nf_pad // block_b

    conv_w, conv_b, fc_w = params["conv_w"], params["conv_b"], params["fc_w"]
    F = conv_w.shape[0]

    # bf16 HBM stream for the pixels (dominant traffic); on-chip math is f32.
    Xq = X[idx].astype(jnp.bfloat16)                                  # (Nf, C, H, W)
    x_rows = jnp.pad(Xq.reshape(Nf, C, HW), ((0, n_pad), (0, 0), (0, 0)))
    x_rows = x_rows.reshape(Nf_pad * C, HW)                           # (Nf_pad*C, HW)

    notmask = (~seg_mask_np[idx]).reshape(Nf, HW).astype(np.float32)
    notmask = jnp.asarray(np.pad(notmask, ((0, n_pad), (0, 0))))      # (Nf_pad, HW)

    # Block-diagonal conv weights per tap, output rows channel-major:
    #   wbd[k, f*B + b, d*C + c] = conv_w[f, c, ky, kx] * (b == d)
    wq = conv_w.astype(jnp.bfloat16).astype(jnp.float32)              # bf16-rounded
    wtaps = wq.reshape(F, C, KH * KW).transpose(2, 0, 1)              # (9, F, C)
    eye = jnp.eye(block_b, dtype=jnp.float32)
    wbd = jnp.einsum("kfc,bd->kfbdc", wtaps, eye)
    wbd = wbd.reshape(KH * KW, F * block_b, block_b * C)

    bias = jnp.repeat(conv_b.astype(jnp.float32), block_b).reshape(F * block_b, 1)
    fcq = fc_w.astype(jnp.bfloat16).astype(jnp.float32)
    s_over = jnp.sum(fcq, axis=0) / float(HW * HW)
    s_tiled = jnp.repeat(s_over, block_b).reshape(F * block_b, 1)

    # Static lane shifts and 'SAME'-padding validity masks for the 9 taps.
    tap_offsets = []
    tapmask_np = np.zeros((KH * KW, HW), np.float32)
    ys, xs = np.meshgrid(np.arange(H), np.arange(W), indexing="ij")
    for k in range(KH * KW):
        dy, dx = k // KW - 1, k % KW - 1
        tap_offsets.append(dy * W + dx)
        valid = (ys + dy >= 0) & (ys + dy < H) & (xs + dx >= 0) & (xs + dx < W)
        tapmask_np[k] = valid.reshape(HW)
    tapmasks = jnp.asarray(tapmask_np)

    kernel = functools.partial(cam_loss_kernel, tap_offsets=tuple(tap_offsets))

    sq, lin, mn_s, mx_s = pl.pallas_call(
        kernel,
        out_shape=[jax.ShapeDtypeStruct((Nf_pad, 1), jnp.float32)] * 4,
        grid=(n_blocks,),
        in_specs=[
            pl.BlockSpec((block_b * C, HW), lambda n: (n, 0)),                  # pixels
            pl.BlockSpec((KH * KW, F * block_b, block_b * C),
                         lambda n: (0, 0, 0)),                                   # weights
            pl.BlockSpec((F * block_b, 1), lambda n: (0, 0)),                    # bias
            pl.BlockSpec((F * block_b, 1), lambda n: (0, 0)),                    # s / HW^2
            pl.BlockSpec((KH * KW, HW), lambda n: (0, 0)),                       # tap masks
            pl.BlockSpec((block_b, HW), lambda n: (n, 0)),                       # ~seg_mask
        ],
        out_specs=[pl.BlockSpec((block_b, 1), lambda n: (n, 0))] * 4,
        compiler_params=pltpu.CompilerParams(dimension_semantics=("parallel",)),
    )(x_rows, wbd, bias, s_tiled, tapmasks, notmask)

    # scale_cam_image is one global min/max normalization (the resize is an
    # identity here):  sum_notmask(((cam - mn) / (EPS + mx - mn))^2)
    # expanded on the per-sample partials (padded samples sliced away).
    sum_sq = jnp.sum(sq[:Nf])
    sum_lin = jnp.sum(lin[:Nf])
    mn = jnp.min(mn_s[:Nf])
    mx = jnp.max(mx_s[:Nf])
    inv = 1.0 / (EPS + (mx - mn))

    count_false = int((~seg_mask_np[idx]).sum())      # len(seg_masks[~seg_masks])
    inverse_prop = len(has_seg_mask_np) / int(has_seg_mask_np.sum())

    pos_sum = (sum_sq - 2.0 * mn * sum_lin + mn * mn * count_false) * inv * inv
    return inverse_prop * pos_sum / (N_total * count_false)


def reference_loss(X, seg_mask_np, has_seg_mask_np, params):
    """Pure-JAX reference (autodiff through the model), mirrors PyTorch semantics.

    Uses the same bf16-rounded inputs / conv / fc weights as the kernel so both
    paths consume identical quantized values (accumulation stays in f32)."""
    N_total, C, H, W = X.shape
    idx = np.nonzero(has_seg_mask_np)[0]
    Xf = X[idx].astype(jnp.bfloat16).astype(jnp.float32)
    segf = jnp.asarray(seg_mask_np[idx])[:, None]                     # (Nf,1,H,W)
    conv_w = params["conv_w"].astype(jnp.bfloat16).astype(jnp.float32)
    conv_b = params["conv_b"].astype(jnp.float32)
    fc_w = params["fc_w"].astype(jnp.bfloat16).astype(jnp.float32)
    fc_b = params["fc_b"].astype(jnp.float32)

    A = lax.conv_general_dilated(
        Xf, conv_w, (1, 1), "SAME",
        dimension_numbers=("NCHW", "OIHW", "NCHW")) + conv_b[None, :, None, None]

    def score(a):
        pooled = jnp.mean(jax.nn.relu(a), axis=(2, 3))
        logits = pooled @ fc_w.T + fc_b
        return jnp.sum(logits)                    # ClassifierOutputAllTargets

    g = jax.grad(score)(A)
    w = jnp.mean(g, axis=(2, 3))
    cam = jnp.maximum(jnp.sum(w[:, :, None, None] * A, axis=1), 0.0)
    cam = cam - cam.min()
    cam = cam / (EPS + cam.max())
    pos_cam = cam[:, None]
    notm = ~segf
    pos_loss = jnp.sum(jnp.where(notm, pos_cam, 0.0) ** 2)
    pos_loss = pos_loss / (N_total * jnp.sum(notm))
    inverse_prop = len(has_seg_mask_np) / np.sum(has_seg_mask_np)
    return inverse_prop * pos_loss


if __name__ == "__main__":
    key = jax.random.PRNGKey(0)
    N, C, H, W = 4, 4, 16, 16
    F, NUM_CLASSES = 8, 5
    k1, k2, k3, k4, k5, k6 = jax.random.split(key, 6)

    X = jax.random.normal(k1, (N, C, H, W), jnp.float32)
    params = {
        "conv_w": 0.2 * jax.random.normal(k2, (F, C, KH, KW), jnp.float32),
        "conv_b": 0.1 * jax.random.normal(k3, (F,), jnp.float32),
        "fc_w": 0.3 * jax.random.normal(k4, (NUM_CLASSES, F), jnp.float32),
        "fc_b": 0.1 * jax.random.normal(k5, (NUM_CLASSES,), jnp.float32),
    }
    # metadata: labels are unused in the all-class-GradCAM branch.
    seg_mask_np = np.asarray(jax.random.uniform(k6, (N, H, W)) > 0.7)
    has_seg_mask_np = np.array([True, False, True, True])

    loss = view_gradcam_loss(X, seg_mask_np, has_seg_mask_np, params)
    loss = jax.block_until_ready(loss)

    ref = reference_loss(X, seg_mask_np, has_seg_mask_np, params)
    ref = jax.block_until_ready(ref)
    assert np.allclose(np.asarray(loss), np.asarray(ref), rtol=2e-4, atol=1e-7), (
        float(loss), float(ref))
    print("KERNEL_OK")
</pallas_src>

<mosaic_0001>
module attributes {stable_mosaic.version = 11 : i64} {
  func.func @cam_loss_kernel(%arg0: i32, %arg1: memref<32x256xbf16, #tpu.memory_space<vmem>>, %arg2: memref<9x64x32xf32, #tpu.memory_space<vmem>>, %arg3: memref<64x1xf32, #tpu.memory_space<vmem>>, %arg4: memref<64x1xf32, #tpu.memory_space<vmem>>, %arg5: memref<9x256xf32, #tpu.memory_space<vmem>>, %arg6: memref<8x256xf32, #tpu.memory_space<vmem>>, %arg7: memref<8x1xf32, #tpu.memory_space<vmem>>, %arg8: memref<8x1xf32, #tpu.memory_space<vmem>>, %arg9: memref<8x1xf32, #tpu.memory_space<vmem>>, %arg10: memref<8x1xf32, #tpu.memory_space<vmem>>) attributes {dimension_semantics = [#tpu.dimension_semantics<parallel>], iteration_bounds = array<i64: 1>, scalar_prefetch = 0 : i64, scratch_operands = 0 : i64, tpu.core_type = #tpu.core_type<tc>, window_params = [{transform_indices = @transform_0, window_bounds = array<i64: 32, 256>}, {pipeline_mode = #tpu.pipeline_mode<synchronous>, transform_indices = @transform_1, window_bounds = array<i64: 9, 64, 32>}, {pipeline_mode = #tpu.pipeline_mode<synchronous>, transform_indices = @transform_2, window_bounds = array<i64: 64, 1>}, {pipeline_mode = #tpu.pipeline_mode<synchronous>, transform_indices = @transform_3, window_bounds = array<i64: 64, 1>}, {pipeline_mode = #tpu.pipeline_mode<synchronous>, transform_indices = @transform_4, window_bounds = array<i64: 9, 256>}, {transform_indices = @transform_5, window_bounds = array<i64: 8, 256>}, {transform_indices = @transform_6, window_bounds = array<i64: 8, 1>}, {transform_indices = @transform_7, window_bounds = array<i64: 8, 1>}, {transform_indices = @transform_8, window_bounds = array<i64: 8, 1>}, {transform_indices = @transform_9, window_bounds = array<i64: 8, 1>}]} {
    %c0 = arith.constant 0 : index
    %c0_0 = arith.constant 0 : index
    %0 = vector.load %arg1[%c0, %c0_0] : memref<32x256xbf16, #tpu.memory_space<vmem>>, vector<32x256xbf16>
    %1 = arith.extf %0 : vector<32x256xbf16> to vector<32x256xf32>
    %c0_1 = arith.constant 0 : index
    %c0_2 = arith.constant 0 : index
    %2 = vector.load %arg5[%c0_1, %c0_2] : memref<9x256xf32, #tpu.memory_space<vmem>>, vector<9x256xf32>
    %cst = arith.constant 0.000000e+00 : f32
    %3 = vector.broadcast %cst : f32 to vector<64x256xf32>
    %c17_i32 = arith.constant 17 : i32
    %4 = tpu.dynamic_rotate %1 by %c17_i32 dim 1 : vector<32x256xf32>, i32 -> vector<32x256xf32>
    %5 = vector.extract_strided_slice %2 {offsets = [0, 0], sizes = [1, 256], strides = [1, 1]} : vector<9x256xf32> to vector<1x256xf32>
    %6 = vector.broadcast %5 : vector<1x256xf32> to vector<32x256xf32>
    %7 = arith.mulf %4, %6 : vector<32x256xf32>
    %c0_3 = arith.constant 0 : index
    %c0_4 = arith.constant 0 : index
    %c0_5 = arith.constant 0 : index
    %8 = vector.load %arg2[%c0_3, %c0_4, %c0_5] : memref<9x64x32xf32, #tpu.memory_space<vmem>>, vector<1x64x32xf32>
    %9 = vector.shape_cast %8 : vector<1x64x32xf32> to vector<64x32xf32>
    %cst_6 = arith.constant dense<0.000000e+00> : vector<64x256xf32>
    %10 = tpu.matmul %9, %7, %cst_6 {dimension_numbers = #tpu.dot_dimension_numbers<[1], [0], [0], [1], [0, 0, 1, 1], [], []>} : vector<64x32xf32>, vector<32x256xf32>, vector<64x256xf32> -> vector<64x256xf32>
    %11 = arith.addf %3, %10 : vector<64x256xf32>
    %c16_i32 = arith.constant 16 : i32
    %12 = tpu.dynamic_rotate %1 by %c16_i32 dim 1 : vector<32x256xf32>, i32 -> vector<32x256xf32>
    %13 = vector.extract_strided_slice %2 {offsets = [1, 0], sizes = [1, 256], strides = [1, 1]} : vector<9x256xf32> to vector<1x256xf32>
    %14 = vector.broadcast %13 : vector<1x256xf32> to vector<32x256xf32>
    %15 = arith.mulf %12, %14 : vector<32x256xf32>
    %c1 = arith.constant 1 : index
    %c0_7 = arith.constant 0 : index
    %c0_8 = arith.constant 0 : index
    %16 = vector.load %arg2[%c1, %c0_7, %c0_8] : memref<9x64x32xf32, #tpu.memory_space<vmem>>, vector<1x64x32xf32>
    %17 = vector.shape_cast %16 : vector<1x64x32xf32> to vector<64x32xf32>
    %cst_9 = arith.constant dense<0.000000e+00> : vector<64x256xf32>
    %18 = tpu.matmul %17, %15, %cst_9 {dimension_numbers = #tpu.dot_dimension_numbers<[1], [0], [0], [1], [0, 0, 1, 1], [], []>} : vector<64x32xf32>, vector<32x256xf32>, vector<64x256xf32> -> vector<64x256xf32>
    %19 = arith.addf %11, %18 : vector<64x256xf32>
    %c15_i32 = arith.constant 15 : i32
    %20 = tpu.dynamic_rotate %1 by %c15_i32 dim 1 : vector<32x256xf32>, i32 -> vector<32x256xf32>
    %21 = vector.extract_strided_slice %2 {offsets = [2, 0], sizes = [1, 256], strides = [1, 1]} : vector<9x256xf32> to vector<1x256xf32>
    %22 = vector.broadcast %21 : vector<1x256xf32> to vector<32x256xf32>
    %23 = arith.mulf %20, %22 : vector<32x256xf32>
    %c2 = arith.constant 2 : index
    %c0_10 = arith.constant 0 : index
    %c0_11 = arith.constant 0 : index
    %24 = vector.load %arg2[%c2, %c0_10, %c0_11] : memref<9x64x32xf32, #tpu.memory_space<vmem>>, vector<1x64x32xf32>
    %25 = vector.shape_cast %24 : vector<1x64x32xf32> to vector<64x32xf32>
    %cst_12 = arith.constant dense<0.000000e+00> : vector<64x256xf32>
    %26 = tpu.matmul %25, %23, %cst_12 {dimension_numbers = #tpu.dot_dimension_numbers<[1], [0], [0], [1], [0, 0, 1, 1], [], []>} : vector<64x32xf32>, vector<32x256xf32>, vector<64x256xf32> -> vector<64x256xf32>
    %27 = arith.addf %19, %26 : vector<64x256xf32>
    %c1_i32 = arith.constant 1 : i32
    %28 = tpu.dynamic_rotate %1 by %c1_i32 dim 1 : vector<32x256xf32>, i32 -> vector<32x256xf32>
    %29 = vector.extract_strided_slice %2 {offsets = [3, 0], sizes = [1, 256], strides = [1, 1]} : vector<9x256xf32> to vector<1x256xf32>
    %30 = vector.broadcast %29 : vector<1x256xf32> to vector<32x256xf32>
    %31 = arith.mulf %28, %30 : vector<32x256xf32>
    %c3 = arith.constant 3 : index
    %c0_13 = arith.constant 0 : index
    %c0_14 = arith.constant 0 : index
    %32 = vector.load %arg2[%c3, %c0_13, %c0_14] : memref<9x64x32xf32, #tpu.memory_space<vmem>>, vector<1x64x32xf32>
    %33 = vector.shape_cast %32 : vector<1x64x32xf32> to vector<64x32xf32>
    %cst_15 = arith.constant dense<0.000000e+00> : vector<64x256xf32>
    %34 = tpu.matmul %33, %31, %cst_15 {dimension_numbers = #tpu.dot_dimension_numbers<[1], [0], [0], [1], [0, 0, 1, 1], [], []>} : vector<64x32xf32>, vector<32x256xf32>, vector<64x256xf32> -> vector<64x256xf32>
    %35 = arith.addf %27, %34 : vector<64x256xf32>
    %36 = vector.extract_strided_slice %2 {offsets = [4, 0], sizes = [1, 256], strides = [1, 1]} : vector<9x256xf32> to vector<1x256xf32>
    %37 = vector.broadcast %36 : vector<1x256xf32> to vector<32x256xf32>
    %38 = arith.mulf %1, %37 : vector<32x256xf32>
    %c4 = arith.constant 4 : index
    %c0_16 = arith.constant 0 : index
    %c0_17 = arith.constant 0 : index
    %39 = vector.load %arg2[%c4, %c0_16, %c0_17] : memref<9x64x32xf32, #tpu.memory_space<vmem>>, vector<1x64x32xf32>
    %40 = vector.shape_cast %39 : vector<1x64x32xf32> to vector<64x32xf32>
    %cst_18 = arith.constant dense<0.000000e+00> : vector<64x256xf32>
    %41 = tpu.matmul %40, %38, %cst_18 {dimension_numbers = #tpu.dot_dimension_numbers<[1], [0], [0], [1], [0, 0, 1, 1], [], []>} : vector<64x32xf32>, vector<32x256xf32>, vector<64x256xf32> -> vector<64x256xf32>
    %42 = arith.addf %35, %41 : vector<64x256xf32>
    %c255_i32 = arith.constant 255 : i32
    %43 = tpu.dynamic_rotate %1 by %c255_i32 dim 1 : vector<32x256xf32>, i32 -> vector<32x256xf32>
    %44 = vector.extract_strided_slice %2 {offsets = [5, 0], sizes = [1, 256], strides = [1, 1]} : vector<9x256xf32> to vector<1x256xf32>
    %45 = vector.broadcast %44 : vector<1x256xf32> to vector<32x256xf32>
    %46 = arith.mulf %43, %45 : vector<32x256xf32>
    %c5 = arith.constant 5 : index
    %c0_19 = arith.constant 0 : index
    %c0_20 = arith.constant 0 : index
    %47 = vector.load %arg2[%c5, %c0_19, %c0_20] : memref<9x64x32xf32, #tpu.memory_space<vmem>>, vector<1x64x32xf32>
    %48 = vector.shape_cast %47 : vector<1x64x32xf32> to vector<64x32xf32>
    %cst_21 = arith.constant dense<0.000000e+00> : vector<64x256xf32>
    %49 = tpu.matmul %48, %46, %cst_21 {dimension_numbers = #tpu.dot_dimension_numbers<[1], [0], [0], [1], [0, 0, 1, 1], [], []>} : vector<64x32xf32>, vector<32x256xf32>, vector<64x256xf32> -> vector<64x256xf32>
    %50 = arith.addf %42, %49 : vector<64x256xf32>
    %c241_i32 = arith.constant 241 : i32
    %51 = tpu.dynamic_rotate %1 by %c241_i32 dim 1 : vector<32x256xf32>, i32 -> vector<32x256xf32>
    %52 = vector.extract_strided_slice %2 {offsets = [6, 0], sizes = [1, 256], strides = [1, 1]} : vector<9x256xf32> to vector<1x256xf32>
    %53 = vector.broadcast %52 : vector<1x256xf32> to vector<32x256xf32>
    %54 = arith.mulf %51, %53 : vector<32x256xf32>
    %c6 = arith.constant 6 : index
    %c0_22 = arith.constant 0 : index
    %c0_23 = arith.constant 0 : index
    %55 = vector.load %arg2[%c6, %c0_22, %c0_23] : memref<9x64x32xf32, #tpu.memory_space<vmem>>, vector<1x64x32xf32>
    %56 = vector.shape_cast %55 : vector<1x64x32xf32> to vector<64x32xf32>
    %cst_24 = arith.constant dense<0.000000e+00> : vector<64x256xf32>
    %57 = tpu.matmul %56, %54, %cst_24 {dimension_numbers = #tpu.dot_dimension_numbers<[1], [0], [0], [1], [0, 0, 1, 1], [], []>} : vector<64x32xf32>, vector<32x256xf32>, vector<64x256xf32> -> vector<64x256xf32>
    %58 = arith.addf %50, %57 : vector<64x256xf32>
    %c240_i32 = arith.constant 240 : i32
    %59 = tpu.dynamic_rotate %1 by %c240_i32 dim 1 : vector<32x256xf32>, i32 -> vector<32x256xf32>
    %60 = vector.extract_strided_slice %2 {offsets = [7, 0], sizes = [1, 256], strides = [1, 1]} : vector<9x256xf32> to vector<1x256xf32>
    %61 = vector.broadcast %60 : vector<1x256xf32> to vector<32x256xf32>
    %62 = arith.mulf %59, %61 : vector<32x256xf32>
    %c7 = arith.constant 7 : index
    %c0_25 = arith.constant 0 : index
    %c0_26 = arith.constant 0 : index
    %63 = vector.load %arg2[%c7, %c0_25, %c0_26] : memref<9x64x32xf32, #tpu.memory_space<vmem>>, vector<1x64x32xf32>
    %64 = vector.shape_cast %63 : vector<1x64x32xf32> to vector<64x32xf32>
    %cst_27 = arith.constant dense<0.000000e+00> : vector<64x256xf32>
    %65 = tpu.matmul %64, %62, %cst_27 {dimension_numbers = #tpu.dot_dimension_numbers<[1], [0], [0], [1], [0, 0, 1, 1], [], []>} : vector<64x32xf32>, vector<32x256xf32>, vector<64x256xf32> -> vector<64x256xf32>
    %66 = arith.addf %58, %65 : vector<64x256xf32>
    %c239_i32 = arith.constant 239 : i32
    %67 = tpu.dynamic_rotate %1 by %c239_i32 dim 1 : vector<32x256xf32>, i32 -> vector<32x256xf32>
    %68 = vector.extract_strided_slice %2 {offsets = [8, 0], sizes = [1, 256], strides = [1, 1]} : vector<9x256xf32> to vector<1x256xf32>
    %69 = vector.broadcast %68 : vector<1x256xf32> to vector<32x256xf32>
    %70 = arith.mulf %67, %69 : vector<32x256xf32>
    %c8 = arith.constant 8 : index
    %c0_28 = arith.constant 0 : index
    %c0_29 = arith.constant 0 : index
    %71 = vector.load %arg2[%c8, %c0_28, %c0_29] : memref<9x64x32xf32, #tpu.memory_space<vmem>>, vector<1x64x32xf32>
    %72 = vector.shape_cast %71 : vector<1x64x32xf32> to vector<64x32xf32>
    %cst_30 = arith.constant dense<0.000000e+00> : vector<64x256xf32>
    %73 = tpu.matmul %72, %70, %cst_30 {dimension_numbers = #tpu.dot_dimension_numbers<[1], [0], [0], [1], [0, 0, 1, 1], [], []>} : vector<64x32xf32>, vector<32x256xf32>, vector<64x256xf32> -> vector<64x256xf32>
    %74 = arith.addf %66, %73 : vector<64x256xf32>
    %c0_31 = arith.constant 0 : index
    %c0_32 = arith.constant 0 : index
    %75 = vector.load %arg3[%c0_31, %c0_32] : memref<64x1xf32, #tpu.memory_space<vmem>>, vector<64x1xf32>
    %76 = vector.broadcast %75 : vector<64x1xf32> to vector<64x256xf32>
    %77 = arith.addf %74, %76 : vector<64x256xf32>
    %cst_33 = arith.constant 0.000000e+00 : f32
    %78 = vector.broadcast %cst_33 : f32 to vector<64x256xf32>
    %79 = arith.cmpf ogt, %77, %78 : vector<64x256xf32>
    %80 = arith.extui %79 : vector<64x256xi1> to vector<64x256xi32>
    %81 = arith.sitofp %80 : vector<64x256xi32> to vector<64x256xf32>
    %c0_34 = arith.constant 0 : index
    %c0_35 = arith.constant 0 : index
    %82 = vector.load %arg4[%c0_34, %c0_35] : memref<64x1xf32, #tpu.memory_space<vmem>>, vector<64x1xf32>
    %cst_36 = arith.constant dense<0.000000e+00> : vector<64xf32>
    %83 = vector.multi_reduction <add>, %81, %cst_36 [1] : vector<64x256xf32> to vector<64xf32>
    %84 = vector.shape_cast %83 : vector<64xf32> to vector<64x1xf32>
    %85 = arith.mulf %82, %84 : vector<64x1xf32>
    %86 = vector.broadcast %85 : vector<64x1xf32> to vector<64x256xf32>
    %87 = arith.mulf %86, %77 : vector<64x256xf32>
    %88 = vector.extract_strided_slice %87 {offsets = [0, 0], sizes = [8, 256], strides = [1, 1]} : vector<64x256xf32> to vector<8x256xf32>
    %89 = vector.extract_strided_slice %87 {offsets = [8, 0], sizes = [8, 256], strides = [1, 1]} : vector<64x256xf32> to vector<8x256xf32>
    %90 = arith.addf %88, %89 : vector<8x256xf32>
    %91 = vector.extract_strided_slice %87 {offsets = [16, 0], sizes = [8, 256], strides = [1, 1]} : vector<64x256xf32> to vector<8x256xf32>
    %92 = arith.addf %90, %91 : vector<8x256xf32>
    %93 = vector.extract_strided_slice %87 {offsets = [24, 0], sizes = [8, 256], strides = [1, 1]} : vector<64x256xf32> to vector<8x256xf32>
    %94 = arith.addf %92, %93 : vector<8x256xf32>
    %95 = vector.extract_strided_slice %87 {offsets = [32, 0], sizes = [8, 256], strides = [1, 1]} : vector<64x256xf32> to vector<8x256xf32>
    %96 = arith.addf %94, %95 : vector<8x256xf32>
    %97 = vector.extract_strided_slice %87 {offsets = [40, 0], sizes = [8, 256], strides = [1, 1]} : vector<64x256xf32> to vector<8x256xf32>
    %98 = arith.addf %96, %97 : vector<8x256xf32>
    %99 = vector.extract_strided_slice %87 {offsets = [48, 0], sizes = [8, 256], strides = [1, 1]} : vector<64x256xf32> to vector<8x256xf32>
    %100 = arith.addf %98, %99 : vector<8x256xf32>
    %101 = vector.extract_strided_slice %87 {offsets = [56, 0], sizes = [8, 256], strides = [1, 1]} : vector<64x256xf32> to vector<8x256xf32>
    %102 = arith.addf %100, %101 : vector<8x256xf32>
    %cst_37 = arith.constant 0.000000e+00 : f32
    %103 = vector.broadcast %cst_37 : f32 to vector<8x256xf32>
    %104 = arith.maximumf %102, %103 : vector<8x256xf32>
    %c0_38 = arith.constant 0 : index
    %c0_39 = arith.constant 0 : index
    %105 = vector.load %arg6[%c0_38, %c0_39] : memref<8x256xf32, #tpu.memory_space<vmem>>, vector<8x256xf32>
    %106 = arith.mulf %105, %104 : vector<8x256xf32>
    %107 = arith.mulf %106, %104 : vector<8x256xf32>
    %cst_40 = arith.constant dense<0.000000e+00> : vector<8xf32>
    %108 = vector.multi_reduction <add>, %107, %cst_40 [1] : vector<8x256xf32> to vector<8xf32>
    %109 = vector.shape_cast %108 : vector<8xf32> to vector<8x1xf32>
    %c0_41 = arith.constant 0 : index
    %c0_42 = arith.constant 0 : index
    %110 = vector.load %arg7[%c0_41, %c0_42] : memref<8x1xf32, #tpu.memory_space<vmem>>, vector<8x1xf32>
    tpu.vector_store %arg7[%c0_41, %c0_42], %109 {strides = array<i32>} : memref<8x1xf32, #tpu.memory_space<vmem>>, vector<8x1xf32>,
    %cst_43 = arith.constant dense<0.000000e+00> : vector<8xf32>
    %111 = vector.multi_reduction <add>, %106, %cst_43 [1] : vector<8x256xf32> to vector<8xf32>
    %112 = vector.shape_cast %111 : vector<8xf32> to vector<8x1xf32>
    %c0_44 = arith.constant 0 : index
    %c0_45 = arith.constant 0 : index
    %113 = vector.load %arg8[%c0_44, %c0_45] : memref<8x1xf32, #tpu.memory_space<vmem>>, vector<8x1xf32>
    tpu.vector_store %arg8[%c0_44, %c0_45], %112 {strides = array<i32>} : memref<8x1xf32, #tpu.memory_space<vmem>>, vector<8x1xf32>,
    %cst_46 = arith.constant dense<0x7F800000> : vector<8xf32>
    %114 = vector.multi_reduction <minimumf>, %104, %cst_46 [1] : vector<8x256xf32> to vector<8xf32>
    %115 = vector.shape_cast %114 : vector<8xf32> to vector<8x1xf32>
    %c0_47 = arith.constant 0 : index
    %c0_48 = arith.constant 0 : index
    %116 = vector.load %arg9[%c0_47, %c0_48] : memref<8x1xf32, #tpu.memory_space<vmem>>, vector<8x1xf32>
    tpu.vector_store %arg9[%c0_47, %c0_48], %115 {strides = array<i32>} : memref<8x1xf32, #tpu.memory_space<vmem>>, vector<8x1xf32>,
    %cst_49 = arith.constant dense<0xFF800000> : vector<8xf32>
    %117 = vector.multi_reduction <maximumf>, %104, %cst_49 [1] : vector<8x256xf32> to vector<8xf32>
    %118 = vector.shape_cast %117 : vector<8xf32> to vector<8x1xf32>
    %c0_50 = arith.constant 0 : index
    %c0_51 = arith.constant 0 : index
    %119 = vector.load %arg10[%c0_50, %c0_51] : memref<8x1xf32, #tpu.memory_space<vmem>>, vector<8x1xf32>
    tpu.vector_store %arg10[%c0_50, %c0_51], %118 {strides = array<i32>} : memref<8x1xf32, #tpu.memory_space<vmem>>, vector<8x1xf32>,
    return
  }
  func.func @transform_0(%arg0: i32) -> (i32, i32) {
    %c0_i32 = arith.constant 0 : i32
    %c0_i32_0 = arith.constant 0 : i32
    return %arg0, %c0_i32 : i32, i32
  }
  func.func @transform_1(%arg0: i32) -> (i32, i32, i32) {
    %c0_i32 = arith.constant 0 : i32
    %c0_i32_0 = arith.constant 0 : i32
    %c0_i32_1 = arith.constant 0 : i32
    %c0_i32_2 = arith.constant 0 : i32
    return %c0_i32, %c0_i32_0, %c0_i32_1 : i32, i32, i32
  }
  func.func @transform_2(%arg0: i32) -> (i32, i32) {
    %c0_i32 = arith.constant 0 : i32
    %c0_i32_0 = arith.constant 0 : i32
    %c0_i32_1 = arith.constant 0 : i32
    return %c0_i32, %c0_i32_0 : i32, i32
  }
  func.func @transform_3(%arg0: i32) -> (i32, i32) {
    %c0_i32 = arith.constant 0 : i32
    %c0_i32_0 = arith.constant 0 : i32
    %c0_i32_1 = arith.constant 0 : i32
    return %c0_i32, %c0_i32_0 : i32, i32
  }
  func.func @transform_4(%arg0: i32) -> (i32, i32) {
    %c0_i32 = arith.constant 0 : i32
    %c0_i32_0 = arith.constant 0 : i32
    %c0_i32_1 = arith.constant 0 : i32
    return %c0_i32, %c0_i32_0 : i32, i32
  }
  func.func @transform_5(%arg0: i32) -> (i32, i32) {
    %c0_i32 = arith.constant 0 : i32
    %c0_i32_0 = arith.constant 0 : i32
    return %arg0, %c0_i32 : i32, i32
  }
  func.func @transform_6(%arg0: i32) -> (i32, i32) {
    %c0_i32 = arith.constant 0 : i32
    %c0_i32_0 = arith.constant 0 : i32
    return %arg0, %c0_i32 : i32, i32
  }
  func.func @transform_7(%arg0: i32) -> (i32, i32) {
    %c0_i32 = arith.constant 0 : i32
    %c0_i32_0 = arith.constant 0 : i32
    return %arg0, %c0_i32 : i32, i32
  }
  func.func @transform_8(%arg0: i32) -> (i32, i32) {
    %c0_i32 = arith.constant 0 : i32
    %c0_i32_0 = arith.constant 0 : i32
    return %arg0, %c0_i32 : i32, i32
  }
  func.func @transform_9(%arg0: i32) -> (i32, i32) {
    %c0_i32 = arith.constant 0 : i32
    %c0_i32_0 = arith.constant 0 : i32
    return %arg0, %c0_i32 : i32, i32
  }
}

</mosaic_0001>

<bundles_post_ra>
// kernel: tpu_custom_call.1
= control target key start
LH: loop header
LB: loop body
LE: loop exit
PB: predicated region body
PF: predicated region fallthrough
CT: control target
= control target key end

     0   :  { %s2413_s17 = smov 17   ;;  %v3602_v16 = vmov 0.0   ;;  %s2415_s18 = smov 15   ;;  %v59_v17 = vlaneseq  ;;  %vm144_vm3 = vcmask 261120   ;;  %s3592_s0 = inlined_call_operand.vmem [shape: bf16[32,256], index: 0, kind: input, shape index: {}]   ;;  %s3593_s4 = inlined_call_operand.vmem [shape: f32[9,256], index: 4, kind: input, shape index: {}]   ;;  %s3594_s1 = inlined_call_operand.vmem [shape: f32[9,64,32], index: 1, kind: input, shape index: {}]   ;;  %s3595_s2 = inlined_call_operand.vmem [shape: f32[64,1], index: 2, kind: input, shape index: {}]   ;;  %s3596_s3 = inlined_call_operand.vmem [shape: f32[64,1], index: 3, kind: input, shape index: {}]   ;;  %s3597_s5 = inlined_call_operand.vmem [shape: f32[8,256], index: 5, kind: input, shape index: {}]   ;;  %s3598_s7 = inlined_call_operand.vmem [shape: f32[8,1], index: 7, kind: output, shape index: {1}]   ;;  %s3599_s6 = inlined_call_operand.vmem [shape: f32[8,1], index: 6, kind: output, shape index: {0}]   ;;  %s3600_s8 = inlined_call_operand.vmem [shape: f32[8,1], index: 8, kind: output, shape index: {2}]   ;;  %s3601_s9 = inlined_call_operand.vmem [shape: f32[8,1], index: 9, kind: output, shape index: {3}]  }
   0x1   :  { %v2475_v0 = vld [vmem:[%s3592_s0 + $0x18] sm:$0xff]  ;;  %v2480_v1 = vld [vmem:[%s3592_s0 + $0x8] sm:$0xff]  ;;  %v2485_v2 = vld [vmem:[%s3592_s0 + $0x10] sm:$0xff]  ;;  %257 = vmatprep.mubr.f32.mxu1 %v3602_v16  ;;  %233 = vmatprep.mubr.f32.mxu0 %v3602_v16  ;;  %s2416_s19 = smov 1   ;;  %s2417_s20 = smov 127  }
   0x2   :  { %v37_v3 = vunpack.c.l.bf16 %v2475_v0  ;;  %v38_v4 = vunpack.c.h.bf16 %v2475_v0  ;;  %v33_v5 = vunpack.c.l.bf16 %v2480_v1  ;;  %v34_v6 = vunpack.c.h.bf16 %v2480_v1  ;;  %v2494_v7 = vld [vmem:[%s3592_s0] sm:$0xff]  ;;  %s2412_s0 = smov 16   ;;  %s2418_s21 = smov 113   ;;  %v2526_v21 = vld [vmem:[%s3593_s4 + $0x8] sm:$0xff] }
   0x3   :  { %v35_v8 = vunpack.c.l.bf16 %v2485_v2  ;;  %v36_v9 = vunpack.c.h.bf16 %v2485_v2  ;;  %v31_v10 = vunpack.c.l.bf16 %v2494_v7  ;;  %v32_v11 = vunpack.c.h.bf16 %v2494_v7  ;;  %s2419_s22 = smov 112   ;;  %s2420_s23 = smov 111   ;;  %v2531_v22 = vld [vmem:[%s3593_s4] sm:$0xff] }
   0x4   :  { %v2250_v12 = vpack.i.bf16 %v38_v4, %v37_v3  ;;  %v2260_v13 = vpack.i.bf16 %v34_v6, %v33_v5  ;;  %v2518_v18 = vshrl.u32 %v59_v17, 7  ;;  %v2520_v19 = vand.u32 127, %v59_v17  ;;  %v90_v7 = vld [vmem:[%s3594_s1 + $0x20] sm:$0xff] }
   0x5   :  { %v2255_v14 = vpack.i.bf16 %v36_v9, %v35_v8  ;;  %v2265_v15 = vpack.i.bf16 %v32_v11, %v31_v10 }
   0x6   :  { %2251 = vrot.lane.b32.xlu0 %v2250_v12, %s2412_s0  ;;  %2261 = vrot.lane.b32.xlu1 %v2260_v13, %s2412_s0  ;;  %v121_v20 = vsub.s32 1, %v2518_v18  ;;  %vm110_vm0 = vcmp.lt.s32.totalorder %v2520_v19, 16  ;;  %v72_v27 = vsub.s32 0, %v2518_v18  ;;  %v446_v32 = vsub.s32 2, %v2518_v18 }
   0x7   :  { %vm61_vm1 = vcmp.lt.s32.totalorder %v2520_v19, 17  ;;  %vm435_vm2 = vcmp.lt.s32.totalorder %v2520_v19, 15  ;;  %vm638_vm4 = vcmp.lt.s32.totalorder %v2520_v19, 1  ;;  %vm1019_vm5 = vcmp.lt.s32.totalorder %v2520_v19, 127 }
   0x8   :  { %v126_v25 = vrot.slane %v2526_v21, %v121_v20  ;;  %v122_v26 = vrot.slane %v2531_v22, %v121_v20  ;;  %v2543_v39 = vrot.slane %v2531_v22, %v72_v27  ;;  %v2548_v45 = vrot.slane %v2531_v22, %v446_v32 }
   0x9   :  { %v2553_v47 = vrot.slane %v2526_v21, %v72_v27  ;;  %vm1222_vm6 = vcmp.lt.s32.totalorder %v2520_v19, 113  ;;  %vm1425_vm7 = vcmp.lt.s32.totalorder %v2520_v19, 112  ;;  %vm1628_vm8 = vcmp.lt.s32.totalorder %v2520_v19, 111  ;;  %v2169_v19 = vld [vmem:[%s3594_s1 + $0x198] sm:$0xff] }
   0xa   :  { %2256 = vrot.lane.b32.xlu0 %v2255_v14, %s2412_s0  ;;  %2266 = vrot.lane.b32.xlu1 %v2265_v15, %s2412_s0 }
   0xe   :  { %2271 = vrot.lane.b32.xlu0 %v2250_v12, %s2413_s17  ;;  %2276 = vrot.lane.b32.xlu1 %v2255_v14, %s2413_s17 }
  0x12   :  { %2281 = vrot.lane.b32.xlu0 %v2250_v12, %s2415_s18  ;;  %2286 = vrot.lane.b32.xlu1 %v2260_v13, %s2413_s17 }
  0x16   :  { %2291 = vrot.lane.b32.xlu0 %v2255_v14, %s2415_s18  ;;  %2296 = vrot.lane.b32.xlu1 %v2265_v15, %s2413_s17 }
  0x1a   :  { %2301 = vrot.lane.b32.xlu0 %v2260_v13, %s2415_s18  ;;  %2306 = vrot.lane.b32.xlu1 %v2265_v15, %s2415_s18 }
  0x1e   :  { %2311 = vrot.lane.b32.xlu0 %v2250_v12, %s2416_s19  ;;  %2316 = vrot.lane.b32.xlu1 %v2255_v14, %s2416_s19 }
  0x22   :  { %2321 = vrot.lane.b32.xlu0 %v2260_v13, %s2416_s19  ;;  %2326 = vrot.lane.b32.xlu1 %v2265_v15, %s2416_s19 }
  0x26   :  { %2331 = vrot.lane.b32.xlu0 %v2250_v12, %s2417_s20  ;;  %2336 = vrot.lane.b32.xlu1 %v2255_v14, %s2417_s20 }
  0x2a   :  { %2341 = vrot.lane.b32.xlu0 %v2250_v12, %s2418_s21  ;;  %2346 = vrot.lane.b32.xlu1 %v2260_v13, %s2417_s20 }
  0x2e   :  { %2351 = vrot.lane.b32.xlu0 %v2255_v14, %s2418_s21  ;;  %2356 = vrot.lane.b32.xlu1 %v2265_v15, %s2417_s20 }
  0x32   :  { %2361 = vrot.lane.b32.xlu0 %v2260_v13, %s2418_s21  ;;  %2366 = vrot.lane.b32.xlu1 %v2265_v15, %s2418_s21 }
  0x36   :  { %2371 = vrot.lane.b32.xlu0 %v2250_v12, %s2419_s22  ;;  %2376 = vrot.lane.b32.xlu1 %v2255_v14, %s2419_s22 }
  0x3a   :  { %2381 = vrot.lane.b32.xlu0 %v2250_v12, %s2420_s23  ;;  %2386 = vrot.lane.b32.xlu1 %v2260_v13, %s2419_s22 }
  0x3e   :  { %2391 = vrot.lane.b32.xlu0 %v2255_v14, %s2420_s23  ;;  %2396 = vrot.lane.b32.xlu1 %v2265_v15, %s2419_s22 }
  0x42   :  { %2401 = vrot.lane.b32.xlu0 %v2260_v13, %s2420_s23  ;;  %2406 = vrot.lane.b32.xlu1 %v2265_v15, %s2420_s23 }
  0x78   :  { %v2252_v23 = vpop.permute.xlu0 %2251  ;;  %v2262_v24 = vpop.permute.xlu1 %2261 }
  0x79   :  { %v2254_v28 = vunpack.i.h.bf16 %v2252_v23  ;;  %v2253_v29 = vunpack.i.l.bf16 %v2252_v23  ;;  %v2264_v30 = vunpack.i.h.bf16 %v2262_v24  ;;  %v2263_v31 = vunpack.i.l.bf16 %v2262_v24 }
  0x7a   :  { %v2574_v24 = vrot.slane %v2526_v21, %v446_v32 }
  0x7b   :  { %v114_v33 = vsel %vm110_vm0, %v2253_v29, %v2254_v28  ;;  %v118_v34 = vsel %vm110_vm0, %v2254_v28, %v2253_v29  ;;  %v112_v40 = vsel %vm110_vm0, %v2263_v31, %v2264_v30  ;;  %v116_v46 = vsel %vm110_vm0, %v2264_v30, %v2263_v31  ;;  %v2082_v29 = vld [vmem:[%s3594_s1 + $0x60] sm:$0xff] }
  0x7c   :  { %v2257_v35 = vpop.permute.xlu0 %2256  ;;  %v134_v36 = vmul.f32 %v126_v25, %v114_v33  ;;  %v133_v37 = vmul.f32 %v122_v26, %v118_v34  ;;  %v2267_v38 = vpop.permute.xlu1 %2266  ;;  %v130_v55 = vmul.f32 %v126_v25, %v112_v40  ;;  %v129_v61 = vmul.f32 %v122_v26, %v116_v46  ;;  %v2078_v31 = vld [vmem:[%s3594_s1 + $0x40] sm:$0xff] }
  0x7d   :  { %v2259_v41 = vunpack.i.h.bf16 %v2257_v35  ;;  %v2258_v42 = vunpack.i.l.bf16 %v2257_v35  ;;  %v2269_v43 = vunpack.i.h.bf16 %v2267_v38  ;;  %v2268_v44 = vunpack.i.l.bf16 %v2267_v38 }
  0x7e   :  { %193 = vmatprep.subr.mxu0 %v134_v36  ;;  %2232 = vmatprep.subr.mxu1 %v134_v36 }
  0x7f   :  { %194 = vmatpush1.msra.mxu0 %v133_v37  ;;  %2236 = vmatpush1.msra.mxu1 %v133_v37  ;;  %v113_v48 = vsel %vm110_vm0, %v2258_v42, %v2259_v41  ;;  %v117_v49 = vsel %vm110_vm0, %v2259_v41, %v2258_v42  ;;  %v111_v50 = vsel %vm110_vm0, %v2268_v44, %v2269_v43  ;;  %v649_v41 = vsub.s32 3, %v2518_v18 }
  0x80   :  { %v2272_v51 = vpop.permute.xlu0 %2271  ;;  %v132_v52 = vmul.f32 %v126_v25, %v113_v48  ;;  %v131_v53 = vmul.f32 %v122_v26, %v117_v49  ;;  %v2277_v54 = vpop.permute.xlu1 %2276  ;;  %v115_v56 = vsel %vm110_vm0, %v2269_v43, %v2268_v44  ;;  %v128_v62 = vmul.f32 %v126_v25, %v111_v50  ;;  %v2083_v50 = vld [vmem:[%s3594_s1 + $0x68] sm:$0xff] }
  0x81   :  { %v2274_v57 = vunpack.i.h.bf16 %v2272_v51  ;;  %v2273_v58 = vunpack.i.l.bf16 %v2272_v51  ;;  %v2279_v59 = vunpack.i.h.bf16 %v2277_v54  ;;  %v2278_v60 = vunpack.i.l.bf16 %v2277_v54  ;;  %v2079_v51 = vld [vmem:[%s3594_s1 + $0x48] sm:$0xff] }
  0x82   :  { %195 = vmatprep.subr.mxu0 %v132_v52  ;;  %2233 = vmatprep.subr.mxu1 %v132_v52  ;;  %v127_v63 = vmul.f32 %v122_v26, %v115_v56 }
  0x83   :  { %v69_v12 = vsel %vm61_vm1, %v2274_v57, %v2273_v58  ;;  %196 = vmatpush1.msra.mxu0 %v131_v53  ;;  %2237 = vmatpush1.msra.mxu1 %v131_v53  ;;  %v68_v13 = vsel %vm61_vm1, %v2279_v59, %v2278_v60  ;;  %v65_v14 = vsel %vm61_vm1, %v2273_v58, %v2274_v57  ;;  %v827_v53 = vsub.s32 4, %v2518_v18 }
  0x84   :  { %v84_v15 = vmul.f32 %v2543_v39, %v69_v12  ;;  %v2282_v17 = vpop.permute.xlu0 %2281  ;;  %197 = vmatprep.subr.mxu0 %v130_v55  ;;  %2234 = vmatprep.subr.mxu1 %v130_v55  ;;  %v2287_v20 = vpop.permute.xlu1 %2286  ;;  %v85_v23 = vmul.f32 %v2553_v47, %v65_v14  ;;  %v82_v30 = vmul.f32 %v2543_v39, %v68_v13 }
  0x85   :  { %v2284_v25 = vunpack.i.h.bf16 %v2282_v17  ;;  %v2283_v26 = vunpack.i.l.bf16 %v2282_v17  ;;  %198 = vmatpush1.msra.mxu0 %v129_v61  ;;  %2238 = vmatpush1.msra.mxu1 %v129_v61  ;;  %v2289_v27 = vunpack.i.h.bf16 %v2287_v20  ;;  %v2288_v28 = vunpack.i.l.bf16 %v2287_v20  ;;  %v2084_v17 = vld [vmem:[%s3594_s1 + $0x70] sm:$0xff] }
  0x86   :  { %199 = vmatprep.subr.mxu0 %v128_v62  ;;  %2235 = vmatprep.subr.mxu1 %v128_v62  ;;  %v64_v32 = vsel %vm61_vm1, %v2278_v60, %v2279_v59  ;;  %v2621_v13 = vrot.slane %v2526_v21, %v649_v41  ;;  %v2080_v20 = vld [vmem:[%s3594_s1 + $0x50] sm:$0xff] }
  0x87   :  { %v443_v33 = vsel %vm435_vm2, %v2284_v25, %v2283_v26  ;;  %v67_v34 = vsel %vm61_vm1, %v2289_v27, %v2288_v28  ;;  %200 = vmatpush1.msra.mxu0 %v127_v63  ;;  %2239 = vmatpush1.msra.mxu1 %v127_v63  ;;  %v83_v35 = vmul.f32 %v2553_v47, %v64_v32 }
  0x88   :  { %v458_v36 = vmul.f32 %v2548_v45, %v443_v33  ;;  %v2292_v37 = vpop.permute.xlu0 %2291  ;;  %2090 = vmatmul.mubr.msk.f32.vlgmr.msra.gmra.mxu1 %vm144_vm3, %v2082_v29  ;;  %330 = vmatprep.subr.mxu1 %v85_v23  ;;  %v439_v38 = vsel %vm435_vm2, %v2283_v26, %v2284_v25  ;;  %v2297_v40 = vpop.permute.xlu1 %2296  ;;  %v80_v48 = vmul.f32 %v2543_v39, %v67_v34 }
  0x89   :  { %v2294_v42 = vunpack.i.h.bf16 %v2292_v37  ;;  %v2293_v43 = vunpack.i.l.bf16 %v2292_v37  ;;  %2086 = vmatmul.mubr.msk.f32.vlgmr.msra.gmra.mxu0 %vm144_vm3, %v2078_v31  ;;  %331 = vmatpush1.msra.mxu1 %v84_v15  ;;  %v459_v44 = vmul.f32 %v2574_v24, %v439_v38  ;;  %v2299_v46 = vunpack.i.h.bf16 %v2297_v40  ;;  %v2081_v37 = vld [vmem:[%s3594_s1 + $0x58] sm:$0xff] }
  0x8a   :  { %332 = vmatprep.subr.mxu1 %v83_v35  ;;  %v2298_v49 = vunpack.i.l.bf16 %v2297_v40  ;;  %263 = vmatprep.mubr.f32.mxu1 %v3602_v16  ;;  %v63_v52 = vsel %vm61_vm1, %v2288_v28, %v2289_v27  ;;  %v2633_v25 = vrot.slane %v2526_v21, %v827_v53 }
  0x8b   :  { %v442_v54 = vsel %vm435_vm2, %v2294_v42, %v2293_v43  ;;  %517 = vmatprep.subr.mxu0 %v459_v44  ;;  %333 = vmatpush1.msra.mxu1 %v82_v30  ;;  %v81_v55 = vmul.f32 %v2553_v47, %v63_v52  ;;  %v438_v56 = vsel %vm435_vm2, %v2293_v43, %v2294_v42 }
  0x8c   :  { %v456_v57 = vmul.f32 %v2548_v45, %v442_v54  ;;  %v66_v58 = vsel %vm61_vm1, %v2299_v46, %v2298_v49  ;;  %518 = vmatpush1.msra.mxu0 %v458_v36  ;;  %v2302_v59 = vpop.permute.xlu0 %2301  ;;  %239 = vmatprep.mubr.f32.mxu0 %v3602_v16  ;;  %v457_v60 = vmul.f32 %v2574_v24, %v438_v56  ;;  %v2307_v61 = vpop.permute.xlu1 %2306  ;;  %v2085_v36 = vld [vmem:[%s3594_s1 + $0x78] sm:$0xff] }
  0x8d   :  { %v2304_v62 = vunpack.i.h.bf16 %v2302_v59  ;;  %v2303_v63 = vunpack.i.l.bf16 %v2302_v59  ;;  %2091 = vmatmul.mubr.msk.f32.gmra.mxu1 %vm144_vm3, %v2083_v50  ;;  %2087 = vmatmul.mubr.msk.f32.gmra.mxu0 %vm144_vm3, %v2079_v51  ;;  %v2309_v12 = vunpack.i.h.bf16 %v2307_v61  ;;  %v78_v14 = vmul.f32 %v2543_v39, %v66_v58 }
  0x8e   :  { %334 = vmatprep.subr.mxu1 %v81_v55  ;;  %519 = vmatprep.subr.mxu0 %v457_v60  ;;  %v2308_v15 = vunpack.i.l.bf16 %v2307_v61  ;;  %v62_v23 = vsel %vm61_vm1, %v2298_v49, %v2299_v46  ;;  %v2662_v42 = vrot.slane %v2531_v22, %v827_v53  ;;  %v86_v53 = vld [vmem:[%s3594_s1] sm:$0xff]  ;;  %v838_v58 = vmul.f32 %v2633_v25, %v36_v9  ;;  %v87_v61 = vld [vmem:[%s3594_s1 + $0x8] sm:$0xff] }
  0x8f   :  { %v441_v39 = vsel %vm435_vm2, %v2304_v62, %v2303_v63  ;;  %335 = vmatpush1.msra.mxu1 %v80_v48  ;;  %269 = vmatprep.mubr.f32.mxu1 %v3602_v16  ;;  %v79_v26 = vmul.f32 %v2553_v47, %v62_v23  ;;  %v437_v27 = vsel %vm435_vm2, %v2303_v63, %v2304_v62  ;;  %v2103_v9 = vld [vmem:[%s3594_s1 + $0x88] sm:$0xff]  ;;  %v1233_v23 = vsub.s32 6, %v2518_v18 }
  0x90   :  { %v454_v28 = vmul.f32 %v2548_v45, %v441_v39  ;;  %v440_v29 = vsel %vm435_vm2, %v2309_v12, %v2308_v15  ;;  %520 = vmatpush1.msra.mxu0 %v456_v57  ;;  %245 = vmatprep.mubr.f32.mxu0 %v3602_v16  ;;  %v2312_v30 = vpop.permute.xlu0 %2311  ;;  %v455_v31 = vmul.f32 %v2574_v24, %v437_v27  ;;  %v2317_v32 = vpop.permute.xlu1 %2316  ;;  %v88_v27 = vld [vmem:[%s3594_s1 + $0x10] sm:$0xff] }
  0x91   :  { %2092 = vmatmul.mubr.msk.f32.gmra.mxu1 %vm144_vm3, %v2084_v17  ;;  %v2649_v47 = vrot.slane %v2531_v22, %v649_v41  ;;  %v2314_v33 = vunpack.i.h.bf16 %v2312_v30  ;;  %v2313_v34 = vunpack.i.l.bf16 %v2312_v30  ;;  %2088 = vmatmul.mubr.msk.f32.gmra.mxu0 %vm144_vm3, %v2080_v20  ;;  %v436_v35 = vsel %vm435_vm2, %v2308_v15, %v2309_v12 }
  0x92   :  { %336 = vmatprep.subr.mxu1 %v79_v26  ;;  %521 = vmatprep.subr.mxu0 %v455_v31  ;;  %v453_v38 = vmul.f32 %v2574_v24, %v436_v35  ;;  %v2319_v40 = vunpack.i.h.bf16 %v2317_v32  ;;  %v2318_v41 = vunpack.i.l.bf16 %v2317_v32  ;;  %v452_v43 = vmul.f32 %v2548_v45, %v440_v29 }
  0x93   :  { %v646_v44 = vsel %vm638_vm4, %v2314_v33, %v2313_v34  ;;  %337 = vmatpush1.msra.mxu1 %v78_v14  ;;  %275 = vmatprep.mubr.f32.mxu1 %v3602_v16  ;;  %v642_v46 = vsel %vm638_vm4, %v2313_v34, %v2314_v33  ;;  %v840_v48 = vmul.f32 %v2633_v25, %v38_v4  ;;  %v2102_v4 = vld [vmem:[%s3594_s1 + $0x80] sm:$0xff]  ;;  %v1030_v14 = vsub.s32 5, %v2518_v18  ;;  %v2105_v34 = vld [vmem:[%s3594_s1 + $0x98] sm:$0xff] }
  0x94   :  { %522 = vmatpush1.msra.mxu0 %v454_v28  ;;  %251 = vmatprep.mubr.f32.mxu0 %v3602_v16  ;;  %v662_v24 = vmul.f32 %v2621_v13, %v642_v46  ;;  %v2322_v49 = vpop.permute.xlu0 %2321  ;;  %v641_v45 = vsel %vm638_vm4, %v2318_v41, %v2319_v40  ;;  %v661_v52 = vmul.f32 %v2649_v47, %v646_v44  ;;  %v2327_v54 = vpop.permute.xlu1 %2326  ;;  %v2104_v28 = vld [vmem:[%s3594_s1 + $0x90] sm:$0xff]  ;;  %v2421_v46 = vmov 0  }
  0x95   :  { %2093 = vmatmul.mubr.msk.f32.gmra.mxu1 %vm144_vm3, %v2085_v36  ;;  %2089 = vmatmul.mubr.msk.f32.gmra.mxu0 %vm144_vm3, %v2081_v37  ;;  %v2324_v50 = vunpack.i.h.bf16 %v2322_v49  ;;  %v2323_v51 = vunpack.i.l.bf16 %v2322_v49  ;;  %v839_v55 = vmul.f32 %v2662_v42, %v37_v3  ;;  %v645_v56 = vsel %vm638_vm4, %v2319_v40, %v2318_v41  ;;  %v91_v41 = vld [vmem:[%s3594_s1 + $0x28] sm:$0xff]  ;;  %v2108_v49 = vld [vmem:[%s3594_s1 + $0xb0] sm:$0xff] }
  0x96   :  { %523 = vmatprep.subr.mxu0 %v453_v38  ;;  %370 = vmatprep.mubr.f32.mxu1 %v3602_v16  ;;  %v660_v57 = vmul.f32 %v2621_v13, %v641_v45  ;;  %v2329_v3 = vunpack.i.h.bf16 %v2327_v54  ;;  %v2328_v60 = vunpack.i.l.bf16 %v2327_v54  ;;  %v659_v62 = vmul.f32 %v2649_v47, %v645_v56  ;;  %v93_v56 = vld [vmem:[%s3594_s1 + $0x38] sm:$0xff] }
  0x97   :  { %524 = vmatpush1.msra.mxu0 %v452_v43  ;;  %720 = vmatprep.subr.mxu1 %v662_v24  ;;  %v640_v0 = vsel %vm638_vm4, %v2323_v51, %v2324_v50  ;;  %v837_v63 = vmul.f32 %v2662_v42, %v35_v8  ;;  %v836_v12 = vmul.f32 %v2633_v25, %v34_v6  ;;  %v1816_v24 = vld [vmem:[%s3595_s2 + $0x8] sm:$0xff] }
  0x98   :  { %557 = vmatprep.mubr.f32.mxu0 %v3602_v16  ;;  %898 = vmatprep.subr.mxu0 %v840_v48  ;;  %v2697_v59 = vpop.permute.xlu0 %2331  ;;  %v644_v15 = vsel %vm638_vm4, %v2324_v50, %v2323_v51  ;;  %v658_v17 = vmul.f32 %v2621_v13, %v640_v0  ;;  %v639_v8 = vsel %vm638_vm4, %v2328_v60, %v2329_v3  ;;  %v2790_v38 = vpop.permute.xlu1 %2336  ;;  %v92_v48 = vld [vmem:[%s3594_s1 + $0x30] sm:$0xff] }
  0x99   :  { %2094 = vmatmul.mubr.msk.f32.vlgmr.msra.gmra.mxu1 %vm144_vm3, %v86_v53  ;;  %2110 = vmatmul.mubr.msk.f32.vlgmr.msra.gmra.mxu0 %vm144_vm3, %v2102_v4  ;;  %v2334_v20 = vunpack.i.h.bf16 %v2697_v59  ;;  %v2333_v6 = vunpack.i.l.bf16 %v2697_v59  ;;  %v835_v29 = vmul.f32 %v2662_v42, %v33_v5  ;;  %v657_v30 = vmul.f32 %v2649_v47, %v644_v15  ;;  %v2118_v15 = vld [vmem:[%s3594_s1 + $0xc0] sm:$0xff] }
  0x9a   :  { %721 = vmatpush1.msra.mxu1 %v661_v52  ;;  %376 = vmatprep.mubr.f32.mxu1 %v3602_v16  ;;  %v834_v31 = vmul.f32 %v2633_v25, %v32_v11  ;;  %v2753_v32 = vrot.slane %v2526_v21, %v1030_v14  ;;  %v643_v1 = vsel %vm638_vm4, %v2329_v3, %v2328_v60  ;;  %v89_v25 = vld [vmem:[%s3594_s1 + $0x18] sm:$0xff]  ;;  %v2339_v45 = vunpack.i.h.bf16 %v2790_v38 }
  0x9b   :  { %899 = vmatpush1.msra.mxu0 %v839_v55  ;;  %563 = vmatprep.mubr.f32.mxu0 %v3602_v16  ;;  %v656_v5 = vmul.f32 %v2621_v13, %v639_v8  ;;  %v2761_v33 = vrot.slane %v2526_v21, %v1233_v23  ;;  %v1027_v11 = vsel %vm1019_vm5, %v2334_v20, %v2333_v6  ;;  %v2338_v50 = vunpack.i.l.bf16 %v2790_v38 }
  0x9c   :  { %722 = vmatprep.subr.mxu1 %v660_v57  ;;  %900 = vmatprep.subr.mxu0 %v838_v58  ;;  %v2724_v2 = vpop.permute.xlu0 %2341  ;;  %v655_v35 = vmul.f32 %v2649_v47, %v643_v1  ;;  %v833_v36 = vmul.f32 %v2662_v42, %v31_v10  ;;  %v1043_v37 = vmul.f32 %v2753_v32, %v1027_v11  ;;  %v2106_v10 = vld [vmem:[%s3594_s1 + $0xa0] sm:$0xff]  ;;  %v2107_v42 = vld [vmem:[%s3594_s1 + $0xa8] sm:$0xff]  ;;  %v2816_v44 = vpop.permute.xlu1 %2346  ;;  %v2109_v57 = vld [vmem:[%s3594_s1 + $0xb8] sm:$0xff]  ;;  %v1436_v11 = vsub.s32 7, %v2518_v18 }
  0x9d   :  { %2095 = vmatmul.mubr.msk.f32.gmra.mxu1 %vm144_vm3, %v87_v61  ;;  %2111 = vmatmul.mubr.msk.f32.gmra.mxu0 %vm144_vm3, %v2103_v9  ;;  %v2344_v39 = vunpack.i.h.bf16 %v2724_v2  ;;  %v2343_v26 = vunpack.i.l.bf16 %v2724_v2  ;;  %v1815_v47 = vld [vmem:[%s3595_s2] sm:$0xff]  ;;  %v2840_v54 = vrot.slane %v2531_v22, %v1030_v14  ;;  %v2845_v55 = vrot.slane %v2531_v22, %v1233_v23  ;;  %v2119_v1 = vld [vmem:[%s3594_s1 + $0xc8] sm:$0xff] }
  0x9e   :  { %382 = vmatprep.mubr.f32.mxu1 %v3602_v16  ;;  %569 = vmatprep.mubr.f32.mxu0 %v3602_v16  ;;  %v1023_v58 = vsel %vm1019_vm5, %v2333_v6, %v2334_v20  ;;  %v1026_v3 = vsel %vm1019_vm5, %v2339_v45, %v2338_v50  ;;  %v2349_v60 = vunpack.i.h.bf16 %v2816_v44  ;;  %v2348_v61 = vunpack.i.l.bf16 %v2816_v44 }
  0x9f   :  { %723 = vmatpush1.msra.mxu1 %v659_v62  ;;  %901 = vmatpush1.msra.mxu0 %v837_v63  ;;  %v1230_v13 = vsel %vm1222_vm6, %v2344_v39, %v2343_v26  ;;  %v1226_v0 = vsel %vm1222_vm6, %v2343_v26, %v2344_v39  ;;  %v1022_v23 = vsel %vm1019_vm5, %v2338_v50, %v2339_v45 }
  0xa0   :  { %724 = vmatprep.subr.mxu1 %v658_v17  ;;  %902 = vmatprep.subr.mxu0 %v836_v12  ;;  %v1246_v40 = vmul.f32 %v2761_v33, %v1230_v13  ;;  %v2352_v43 = vpop.permute.xlu0 %2351  ;;  %v2833_v52 = vpop.permute.xlu1 %2356  ;;  %v1042_v12 = vmul.f32 %v2840_v54, %v1023_v58  ;;  %v1245_v14 = vmul.f32 %v2845_v55, %v1226_v0  ;;  %v2134_v17 = vld [vmem:[%s3594_s1 + $0x100] sm:$0xff]  ;;  %v1817_v0 = vld [vmem:[%s3595_s2 + $0x10] sm:$0xff] }
  0xa1   :  { %2096 = vmatmul.mubr.msk.f32.gmra.mxu1 %vm144_vm3, %v88_v27  ;;  %2112 = vmatmul.mubr.msk.f32.gmra.mxu0 %vm144_vm3, %v2104_v28  ;;  %v2354_v53 = vunpack.i.h.bf16 %v2352_v43  ;;  %v2353_v4 = vunpack.i.l.bf16 %v2352_v43  ;;  %v1041_v2 = vmul.f32 %v2753_v32, %v1026_v3  ;;  %v2359_v6 = vunpack.i.h.bf16 %v2833_v52  ;;  %v2136_v43 = vld [vmem:[%s3594_s1 + $0x110] sm:$0xff]  ;;  %v2123_v3 = vld [vmem:[%s3594_s1 + $0xe8] sm:$0xff] }
  0xa2   :  { %388 = vmatprep.mubr.f32.mxu1 %v3602_v16  ;;  %575 = vmatprep.mubr.f32.mxu0 %v3602_v16  ;;  %v2358_v26 = vunpack.i.l.bf16 %v2833_v52  ;;  %v1025_v27 = vsel %vm1019_vm5, %v2349_v60, %v2348_v61  ;;  %v2943_v44 = vrot.slane %v2526_v21, %v1436_v11  ;;  %v2137_v52 = vld [vmem:[%s3594_s1 + $0x118] sm:$0xff] }
  0xa3   :  { %725 = vmatpush1.msra.mxu1 %v657_v30  ;;  %903 = vmatpush1.msra.mxu0 %v835_v29  ;;  %v1229_v59 = vsel %vm1222_vm6, %v2354_v53, %v2353_v4  ;;  %v1225_v8 = vsel %vm1222_vm6, %v2353_v4, %v2354_v53 }
  0xa4   :  { %726 = vmatprep.subr.mxu1 %v656_v5  ;;  %904 = vmatprep.subr.mxu0 %v834_v31  ;;  %v2362_v51 = vpop.permute.xlu0 %2361  ;;  %v2367_v20 = vpop.permute.xlu1 %2366  ;;  %v1244_v39 = vmul.f32 %v2761_v33, %v1229_v59  ;;  %v1040_v31 = vmul.f32 %v2840_v54, %v1022_v23  ;;  %v2135_v5 = vld [vmem:[%s3594_s1 + $0x108] sm:$0xff]  ;;  %v1024_v38 = vsel %vm1019_vm5, %v2359_v6, %v2358_v26  ;;  %v1818_v59 = vld [vmem:[%s3595_s2 + $0x18] sm:$0xff] }
  0xa5   :  { %2097 = vmatmul.mubr.msk.f32.gmra.mxu1 %vm144_vm3, %v89_v25  ;;  %2113 = vmatmul.mubr.msk.f32.gmra.mxu0 %vm144_vm3, %v2105_v34  ;;  %v2364_v62 = vunpack.i.h.bf16 %v2362_v51  ;;  %v2363_v63 = vunpack.i.l.bf16 %v2362_v51  ;;  %v2369_v29 = vunpack.i.h.bf16 %v2367_v20  ;;  %v2368_v30 = vunpack.i.l.bf16 %v2367_v20  ;;  %v2964_v51 = vld [vmem:[%s3593_s4 + $0x18] ss:$0 sm:$0xff] }
  0xa6   :  { %394 = vmatprep.mubr.f32.mxu1 %v3602_v16  ;;  %581 = vmatprep.mubr.f32.mxu0 %v3602_v16  ;;  %v1243_v25 = vmul.f32 %v2845_v55, %v1225_v8  ;;  %v1021_v34 = vsel %vm1019_vm5, %v2348_v61, %v2349_v60  ;;  %v1037_v45 = vmul.f32 %v2753_v32, %v1024_v38  ;;  %v2139_v60 = vld [vmem:[%s3594_s1 + $0x128] sm:$0xff]  ;;  %v1821_v8 = vld [vmem:[%s3595_s2 + $0x30] sm:$0xff] }
  0xa7   :  { %727 = vmatpush1.msra.mxu1 %v655_v35  ;;  %905 = vmatpush1.msra.mxu0 %v833_v36  ;;  %v1228_v28 = vsel %vm1222_vm6, %v2364_v62, %v2363_v63  ;;  %v1039_v35 = vmul.f32 %v2753_v32, %v1025_v27  ;;  %v1224_v36 = vsel %vm1222_vm6, %v2363_v63, %v2364_v62  ;;  %v1819_v63 = vld [vmem:[%s3595_s2 + $0x20] sm:$0xff]  ;;  %v2141_v27 = vld [vmem:[%s3594_s1 + $0x138] sm:$0xff] }
  0xa8   :  { %1101 = vmatprep.subr.mxu1 %v1043_v37  ;;  %1304 = vmatprep.subr.mxu0 %v1246_v40  ;;  %v2871_v9 = vpop.permute.xlu0 %2371  ;;  %v1242_v37 = vmul.f32 %v2761_v33, %v1228_v28 }
  0xa9   :  { %2098 = vmatmul.mubr.msk.f32.gmra.mxu1 %vm144_vm3, %v90_v7  ;;  %2114 = vmatmul.mubr.msk.f32.gmra.mxu0 %vm144_vm3, %v2106_v10  ;;  %v2374_v40 = vunpack.i.h.bf16 %v2871_v9  ;;  %v2373_v7 = vunpack.i.l.bf16 %v2871_v9  ;;  %v1227_v10 = vsel %vm1222_vm6, %v2369_v29, %v2368_v30  ;;  %v1822_v9 = vld [vmem:[%s3595_s2 + $0x38] sm:$0xff] }
  0xaa   :  { %400 = vmatprep.mubr.f32.mxu1 %v3602_v16  ;;  %587 = vmatprep.mubr.f32.mxu0 %v3602_v16  ;;  %v1240_v50 = vmul.f32 %v2761_v33, %v1227_v10  ;;  %v2121_v33 = vld [vmem:[%s3594_s1 + $0xd8] sm:$0xff] }
  0xab   :  { %2410 = vset.pattern.permute.xlu0 %v2421_v46  ;;  %2411 = vset.pattern.permute.xlu1 %v2421_v46  ;;  %v1038_v46 = vmul.f32 %v2840_v54, %v1021_v34  ;;  %v1433_v21 = vsel %vm1425_vm7, %v2374_v40, %v2373_v7  ;;  %v1429_v18 = vsel %vm1425_vm7, %v2373_v7, %v2374_v40 }
  0xac   :  { %1825 = vperm.xlu0 %2410, %v1815_v47   ;;  %1830 = vperm.xlu1 %2411, %v1816_v24   ;;  %v2909_v13 = vpop.permute.xlu0 %2381  ;;  %v1241_v24 = vmul.f32 %v2845_v55, %v1224_v36  ;;  %v2166_v36 = vld [vmem:[%s3594_s1 + $0x180] sm:$0xff] }
  0xad   :  { %2099 = vmatmul.mubr.msk.f32.gmra.mxu1 %vm144_vm3, %v91_v41  ;;  %2115 = vmatmul.mubr.msk.f32.gmra.mxu0 %vm144_vm3, %v2107_v42  ;;  %v2384_v47 = vunpack.i.h.bf16 %v2909_v13  ;;  %v2383_v41 = vunpack.i.l.bf16 %v2909_v13  ;;  %v2120_v42 = vld [vmem:[%s3594_s1 + $0xd0] sm:$0xff] }
  0xae   :  { %406 = vmatprep.mubr.f32.mxu1 %v3602_v16  ;;  %593 = vmatprep.mubr.f32.mxu0 %v3602_v16 }
  0xaf   :  { %v1636_v32 = vsel %vm1628_vm8, %v2384_v47, %v2383_v41 }
  0xb0   :  { %v1652_v58 = vmul.f32 %v2964_v51, %v1636_v32  ;;  %1835 = vperm.xlu1 %2411, %v1817_v0   ;;  %v2392_v62 = vpop.permute.xlu0 %2391  ;;  %1840 = vperm.xlu0 %2410, %v1818_v59   ;;  %v2154_v59 = vld [vmem:[%s3594_s1 + $0x160] sm:$0xff] }
  0xb1   :  { %2100 = vmatmul.mubr.msk.f32.gmra.mxu1 %vm144_vm3, %v92_v48  ;;  %2116 = vmatmul.mubr.msk.f32.gmra.mxu0 %vm144_vm3, %v2108_v49  ;;  %v1020_v48 = vsel %vm1019_vm5, %v2358_v26, %v2359_v6  ;;  %v1223_v49 = vsel %vm1222_vm6, %v2368_v30, %v2369_v29  ;;  %v2393_v6 = vunpack.i.l.bf16 %v2392_v62  ;;  %v2125_v26 = vld [vmem:[%s3594_s1 + $0xf8] sm:$0xff]  ;;  %v1632_v29 = vsel %vm1628_vm8, %v2383_v41, %v2384_v47 }
  0xb2   :  { %412 = vmatprep.mubr.f32.mxu1 %v3602_v16  ;;  %599 = vmatprep.mubr.f32.mxu0 %v3602_v16  ;;  %v1036_v53 = vmul.f32 %v2840_v54, %v1020_v48  ;;  %v1239_v4 = vmul.f32 %v2845_v55, %v1223_v49  ;;  %v2122_v54 = vld [vmem:[%s3594_s1 + $0xe0] sm:$0xff]  ;;  %v2151_v48 = vld [vmem:[%s3594_s1 + $0x148] sm:$0xff] }
  0xb3   :  { %v2138_v55 = vld [vmem:[%s3594_s1 + $0x120] sm:$0xff]  ;;  %v2167_v49 = vld [vmem:[%s3594_s1 + $0x188] sm:$0xff] }
  0xb4   :  { %1845 = vperm.xlu1 %2411, %v1819_v63   ;;  %v2402_v28 = vpop.permute.xlu0 %2401  ;;  %v2155_v63 = vld [vmem:[%s3594_s1 + $0x168] sm:$0xff] }
  0xb5   :  { %2101 = vmatmul.mubr.msk.f32.gmra.mxu1 %vm144_vm3, %v93_v56  ;;  %2117 = vmatmul.mubr.msk.f32.gmra.mxu0 %vm144_vm3, %v2109_v57  ;;  %v1449_v56 = vmul.f32 %v2943_v44, %v1433_v21  ;;  %v2983_v57 = vpop.permute.xlu1 %2376  ;;  %v2403_v13 = vunpack.i.l.bf16 %v2402_v28 }
  0xb6   :  { %760 = vmatprep.mubr.f32.mxu1 %v3602_v16  ;;  %938 = vmatprep.mubr.f32.mxu0 %v3602_v16  ;;  %v2378_v20 = vunpack.i.l.bf16 %v2983_v57 }
  0xb8   :  { %1855 = vperm.xlu1 %2411, %v1821_v8   ;;  %v2201_v8 = vld [vmem:[%s3594_s1 + $0x208] sm:$0xff] }
  0xb9   :  { %2126 = vmatmul.mubr.msk.f32.vlgmr.msra.gmra.mxu1 %vm144_vm3, %v2118_v15  ;;  %2142 = vmatmul.mubr.msk.f32.vlgmr.msra.gmra.mxu0 %vm144_vm3, %v2134_v17  ;;  %v3009_v61 = vpop.permute.xlu1 %2386  ;;  %v1820_v15 = vld [vmem:[%s3595_s2 + $0x28] sm:$0xff]  ;;  %v2379_v17 = vunpack.i.h.bf16 %v2983_v57  ;;  %v2168_v57 = vld [vmem:[%s3594_s1 + $0x190] sm:$0xff] }
  0xba   :  { %1102 = vmatpush1.msra.mxu1 %v1042_v12  ;;  %1305 = vmatpush1.msra.mxu0 %v1245_v14  ;;  %v2124_v12 = vld [vmem:[%s3594_s1 + $0xf0] sm:$0xff] }
  0xbb   :  { %766 = vmatprep.mubr.f32.mxu1 %v3602_v16  ;;  %944 = vmatprep.mubr.f32.mxu0 %v3602_v16  ;;  %v2140_v14 = vld [vmem:[%s3594_s1 + $0x130] sm:$0xff]  ;;  %v1432_v30 = vsel %vm1425_vm7, %v2379_v17, %v2378_v20  ;;  %v1428_v38 = vsel %vm1425_vm7, %v2378_v20, %v2379_v17  ;;  %v2157_v17 = vld [vmem:[%s3594_s1 + $0x178] sm:$0xff] }
  0xbc   :  { %1103 = vmatprep.subr.mxu1 %v1041_v2  ;;  %1306 = vmatprep.subr.mxu0 %v1244_v39  ;;  %v2394_v2 = vunpack.i.h.bf16 %v2392_v62  ;;  %v3042_v39 = vrot.slane %v2531_v22, %v1436_v11  ;;  %v3061_v22 = vld [vmem:[%s3593_s4 + $0x10] ss:$0 sm:$0xff]  ;;  %v2404_v11 = vunpack.i.h.bf16 %v2402_v28  ;;  %v1447_v40 = vmul.f32 %v2943_v44, %v1432_v30  ;;  %v2170_v62 = vld [vmem:[%s3594_s1 + $0x1a0] sm:$0xff]  ;;  %v2173_v20 = vld [vmem:[%s3594_s1 + $0x1b8] sm:$0xff] }
  0xbd   :  { %2127 = vmatmul.mubr.msk.f32.gmra.mxu1 %vm144_vm3, %v2119_v1  ;;  %2143 = vmatmul.mubr.msk.f32.gmra.mxu0 %vm144_vm3, %v2135_v5  ;;  %v3032_v23 = vpop.permute.xlu1 %2396  ;;  %v2388_v1 = vunpack.i.l.bf16 %v3009_v61  ;;  %v1651_v34 = vmul.f32 %v3061_v22, %v1632_v29  ;;  %v2203_v28 = vld [vmem:[%s3594_s1 + $0x218] sm:$0xff]  ;;  %v2187_v29 = vld [vmem:[%s3594_s1 + $0x1e8] sm:$0xff]  ;;  %v2188_v30 = vld [vmem:[%s3594_s1 + $0x1f0] sm:$0xff] }
  0xbe   :  { %772 = vmatprep.mubr.f32.mxu1 %v3602_v16  ;;  %950 = vmatprep.mubr.f32.mxu0 %v3602_v16  ;;  %v1635_v5 = vsel %vm1628_vm8, %v2394_v2, %v2393_v6  ;;  %v1631_v7 = vsel %vm1628_vm8, %v2393_v6, %v2394_v2  ;;  %v2399_v47 = vunpack.i.h.bf16 %v3032_v23  ;;  %v1630_v32 = vsel %vm1628_vm8, %v2403_v13, %v2404_v11  ;;  %v2200_v2 = vld [vmem:[%s3594_s1 + $0x200] sm:$0xff]  ;;  %v2183_v6 = vld [vmem:[%s3594_s1 + $0x1c8] sm:$0xff] }
  0xbf   :  { %1104 = vmatpush1.msra.mxu1 %v1040_v31  ;;  %1307 = vmatpush1.msra.mxu0 %v1243_v25  ;;  %v2389_v31 = vunpack.i.h.bf16 %v3009_v61  ;;  %v1448_v25 = vmul.f32 %v3042_v39, %v1429_v18  ;;  %v1650_v10 = vmul.f32 %v2964_v51, %v1635_v5  ;;  %v2153_v61 = vld [vmem:[%s3594_s1 + $0x158] sm:$0xff]  ;;  %v2186_v18 = vld [vmem:[%s3594_s1 + $0x1e0] sm:$0xff] }
  0xc0   :  { %1105 = vmatprep.subr.mxu1 %v1039_v35  ;;  %1308 = vmatprep.subr.mxu0 %v1242_v37  ;;  %v2150_v35 = vld [vmem:[%s3594_s1 + $0x140] sm:$0xff]  ;;  %v2207_v5 = vld [vmem:[%s3594_s1 + $0x238] sm:$0xff] }
  0xc1   :  { %2128 = vmatmul.mubr.msk.f32.gmra.mxu1 %vm144_vm3, %v2120_v42  ;;  %2144 = vmatmul.mubr.msk.f32.gmra.mxu0 %vm144_vm3, %v2136_v43  ;;  %v2407_v37 = vpop.permute.xlu1 %2406  ;;  %v1431_v41 = vsel %vm1425_vm7, %v2389_v31, %v2388_v1  ;;  %v2398_v42 = vunpack.i.l.bf16 %v3032_v23  ;;  %v1634_v43 = vsel %vm1628_vm8, %v2404_v11, %v2403_v13  ;;  %v1427_v21 = vsel %vm1425_vm7, %v2388_v1, %v2389_v31  ;;  %v2182_v23 = vld [vmem:[%s3594_s1 + $0x1c0] sm:$0xff]  ;;  %v2206_v31 = vld [vmem:[%s3594_s1 + $0x230] sm:$0xff]  ;;  %v2189_v1 = vld [vmem:[%s3594_s1 + $0x1f8] sm:$0xff] }
  0xc2   :  { %778 = vmatprep.mubr.f32.mxu1 %v3602_v16  ;;  %956 = vmatprep.mubr.f32.mxu0 %v3602_v16 }
  0xc3   :  { %1106 = vmatpush1.msra.mxu1 %v1038_v46  ;;  %1309 = vmatpush1.msra.mxu0 %v1241_v24  ;;  %v2409_v46 = vunpack.i.h.bf16 %v2407_v37  ;;  %v2408_v24 = vunpack.i.l.bf16 %v2407_v37 }
  0xc4   :  { %1107 = vmatprep.subr.mxu1 %v1037_v45  ;;  %1310 = vmatprep.subr.mxu0 %v1240_v50  ;;  %v1446_v45 = vmul.f32 %v3042_v39, %v1428_v38  ;;  %v1649_v50 = vmul.f32 %v3061_v22, %v1631_v7 }
  0xc5   :  { %2129 = vmatmul.mubr.msk.f32.gmra.mxu1 %vm144_vm3, %v2121_v33  ;;  %2145 = vmatmul.mubr.msk.f32.gmra.mxu0 %vm144_vm3, %v2137_v52  ;;  %v1445_v33 = vmul.f32 %v2943_v44, %v1431_v41  ;;  %v1648_v52 = vmul.f32 %v2964_v51, %v1634_v43  ;;  %v1629_v0 = vsel %vm1628_vm8, %v2408_v24, %v2409_v46 }
  0xc6   :  { %784 = vmatprep.mubr.f32.mxu1 %v3602_v16  ;;  %962 = vmatprep.mubr.f32.mxu0 %v3602_v16 }
  0xc7   :  { %1108 = vmatpush1.msra.mxu1 %v1036_v53  ;;  %1311 = vmatpush1.msra.mxu0 %v1239_v4  ;;  %v1430_v53 = vsel %vm1425_vm7, %v2399_v47, %v2398_v42  ;;  %v1633_v4 = vsel %vm1628_vm8, %v2409_v46, %v2408_v24 }
  0xc8   :  { %1507 = vmatprep.subr.mxu1 %v1449_v56  ;;  %1710 = vmatprep.subr.mxu0 %v1652_v58  ;;  %v2152_v56 = vld [vmem:[%s3594_s1 + $0x150] sm:$0xff]  ;;  %v1444_v58 = vmul.f32 %v3042_v39, %v1427_v21 }
  0xc9   :  { %2130 = vmatmul.mubr.msk.f32.gmra.mxu1 %vm144_vm3, %v2122_v54  ;;  %2146 = vmatmul.mubr.msk.f32.gmra.mxu0 %vm144_vm3, %v2138_v55  ;;  %v1647_v54 = vmul.f32 %v3061_v22, %v1630_v32  ;;  %v1426_v55 = vsel %vm1425_vm7, %v2398_v42, %v2399_v47 }
  0xca   :  { %790 = vmatprep.mubr.f32.mxu1 %v3602_v16  ;;  %968 = vmatprep.mubr.f32.mxu0 %v3602_v16 }
  0xcb   :  { %1850 = vperm.xlu0 %2410, %v1820_v15   ;;  %v2172_v15 = vld [vmem:[%s3594_s1 + $0x1b0] sm:$0xff] }
  0xcd   :  { %2131 = vmatmul.mubr.msk.f32.gmra.mxu1 %vm144_vm3, %v2123_v3  ;;  %2147 = vmatmul.mubr.msk.f32.gmra.mxu0 %vm144_vm3, %v2139_v60  ;;  %v1443_v3 = vmul.f32 %v2943_v44, %v1430_v53  ;;  %v1646_v60 = vmul.f32 %v2964_v51, %v1633_v4  ;;  %v1442_v44 = vmul.f32 %v3042_v39, %v1426_v55  ;;  %v2184_v39 = vld [vmem:[%s3594_s1 + $0x1d0] sm:$0xff] }
  0xce   :  { %796 = vmatprep.mubr.f32.mxu1 %v3602_v16  ;;  %974 = vmatprep.mubr.f32.mxu0 %v3602_v16  ;;  %v1645_v51 = vmul.f32 %v3061_v22, %v1629_v0  ;;  %v2204_v22 = vld [vmem:[%s3594_s1 + $0x220] sm:$0xff] }
  0xcf   :  { %1860 = vperm.xlu0 %2410, %v1822_v9   ;;  %v2205_v9 = vld [vmem:[%s3594_s1 + $0x228] sm:$0xff] }
  0xd1   :  { %2132 = vmatmul.mubr.msk.f32.gmra.mxu1 %vm144_vm3, %v2124_v12  ;;  %2148 = vmatmul.mubr.msk.f32.gmra.mxu0 %vm144_vm3, %v2140_v14  ;;  %v2171_v12 = vld [vmem:[%s3594_s1 + $0x1a8] sm:$0xff]  ;;  %v2156_v14 = vld [vmem:[%s3594_s1 + $0x170] sm:$0xff] }
  0xd2   :  { %802 = vmatprep.mubr.f32.mxu1 %v3602_v16  ;;  %980 = vmatprep.mubr.f32.mxu0 %v3602_v16 }
  0xd5   :  { %2133 = vmatmul.mubr.msk.f32.gmra.mxu1 %vm144_vm3, %v2125_v26  ;;  %2149 = vmatmul.mubr.msk.f32.gmra.mxu0 %vm144_vm3, %v2141_v27  ;;  %v2202_v26 = vld [vmem:[%s3594_s1 + $0x210] sm:$0xff]  ;;  %v2185_v27 = vld [vmem:[%s3594_s1 + $0x1d8] sm:$0xff] }
  0xd6   :  { %1141 = vmatprep.mubr.f32.mxu1 %v3602_v16  ;;  %1344 = vmatprep.mubr.f32.mxu0 %v3602_v16 }
  0xd9   :  { %2158 = vmatmul.mubr.msk.f32.vlgmr.msra.gmra.mxu1 %vm144_vm3, %v2150_v35  ;;  %2174 = vmatmul.mubr.msk.f32.vlgmr.msra.gmra.mxu0 %vm144_vm3, %v2166_v36 }
  0xda   :  { %1508 = vmatpush1.msra.mxu1 %v1448_v25  ;;  %1711 = vmatpush1.msra.mxu0 %v1651_v34 }
  0xdb   :  { %1147 = vmatprep.mubr.f32.mxu1 %v3602_v16  ;;  %1350 = vmatprep.mubr.f32.mxu0 %v3602_v16 }
  0xdc   :  { %1509 = vmatprep.subr.mxu1 %v1447_v40  ;;  %1712 = vmatprep.subr.mxu0 %v1650_v10 }
  0xdd   :  { %2159 = vmatmul.mubr.msk.f32.gmra.mxu1 %vm144_vm3, %v2151_v48  ;;  %2175 = vmatmul.mubr.msk.f32.gmra.mxu0 %vm144_vm3, %v2167_v49 }
  0xde   :  { %1153 = vmatprep.mubr.f32.mxu1 %v3602_v16  ;;  %1356 = vmatprep.mubr.f32.mxu0 %v3602_v16 }
  0xdf   :  { %1510 = vmatpush1.msra.mxu1 %v1446_v45  ;;  %1713 = vmatpush1.msra.mxu0 %v1649_v50 }
  0xe0   :  { %1511 = vmatprep.subr.mxu1 %v1445_v33  ;;  %1714 = vmatprep.subr.mxu0 %v1648_v52 }
  0xe1   :  { %2160 = vmatmul.mubr.msk.f32.gmra.mxu1 %vm144_vm3, %v2152_v56  ;;  %2176 = vmatmul.mubr.msk.f32.gmra.mxu0 %vm144_vm3, %v2168_v57 }
  0xe2   :  { %1159 = vmatprep.mubr.f32.mxu1 %v3602_v16  ;;  %1362 = vmatprep.mubr.f32.mxu0 %v3602_v16 }
  0xe3   :  { %1512 = vmatpush1.msra.mxu1 %v1444_v58  ;;  %1715 = vmatpush1.msra.mxu0 %v1647_v54 }
  0xe4   :  { %1513 = vmatprep.subr.mxu1 %v1443_v3  ;;  %1716 = vmatprep.subr.mxu0 %v1646_v60 }
  0xe5   :  { %2161 = vmatmul.mubr.msk.f32.gmra.mxu1 %vm144_vm3, %v2153_v61  ;;  %2177 = vmatmul.mubr.msk.f32.gmra.mxu0 %vm144_vm3, %v2169_v19 }
  0xe6   :  { %1165 = vmatprep.mubr.f32.mxu1 %v3602_v16  ;;  %1368 = vmatprep.mubr.f32.mxu0 %v3602_v16 }
  0xe7   :  { %1514 = vmatpush1.msra.mxu1 %v1442_v44  ;;  %1717 = vmatpush1.msra.mxu0 %v1645_v51 }
  0xe9   :  { %2162 = vmatmul.mubr.msk.f32.gmra.mxu1 %vm144_vm3, %v2154_v59  ;;  %2178 = vmatmul.mubr.msk.f32.gmra.mxu0 %vm144_vm3, %v2170_v62 }
  0xea   :  { %1171 = vmatprep.mubr.f32.mxu1 %v3602_v16  ;;  %1374 = vmatprep.mubr.f32.mxu0 %v3602_v16 }
  0xed   :  { %2163 = vmatmul.mubr.msk.f32.gmra.mxu1 %vm144_vm3, %v2155_v63  ;;  %2179 = vmatmul.mubr.msk.f32.gmra.mxu0 %vm144_vm3, %v2171_v12 }
  0xee   :  { %1177 = vmatprep.mubr.f32.mxu1 %v3602_v16  ;;  %1380 = vmatprep.mubr.f32.mxu0 %v3602_v16 }
  0xf1   :  { %2164 = vmatmul.mubr.msk.f32.gmra.mxu1 %vm144_vm3, %v2156_v14  ;;  %2180 = vmatmul.mubr.msk.f32.gmra.mxu0 %vm144_vm3, %v2172_v15 }
  0xf2   :  { %1183 = vmatprep.mubr.f32.mxu1 %v3602_v16  ;;  %1386 = vmatprep.mubr.f32.mxu0 %v3602_v16 }
  0xf5   :  { %2165 = vmatmul.mubr.msk.f32.gmra.mxu1 %vm144_vm3, %v2157_v17  ;;  %2181 = vmatmul.mubr.msk.f32.gmra.mxu0 %vm144_vm3, %v2173_v20 }
  0xf6   :  { %1547 = vmatprep.mubr.f32.mxu1 %v3602_v16  ;;  %1750 = vmatprep.mubr.f32.mxu0 %v3602_v16 }
  0xf9   :  { %2190 = vmatmul.mubr.msk.f32.vlgmr.msra.gmra.mxu1 %vm144_vm3, %v2182_v23  ;;  %2208 = vmatmul.mubr.msk.f32.vlgmr.msra.gmra.mxu0 %vm144_vm3, %v2200_v2 }
  0xfa   :  { %1553 = vmatprep.mubr.f32.mxu1 %v3602_v16  ;;  %1756 = vmatprep.mubr.f32.mxu0 %v3602_v16 }
  0xfd   :  { %2191 = vmatmul.mubr.msk.f32.gmra.mxu1 %vm144_vm3, %v2183_v6  ;;  %2209 = vmatmul.mubr.msk.f32.gmra.mxu0 %vm144_vm3, %v2201_v8 }
  0xfe   :  { %1559 = vmatprep.mubr.f32.mxu1 %v3602_v16  ;;  %1762 = vmatprep.mubr.f32.mxu0 %v3602_v16 }
 0x101   :  { %2192 = vmatmul.mubr.msk.f32.gmra.mxu1 %vm144_vm3, %v2184_v39  ;;  %2210 = vmatmul.mubr.msk.f32.gmra.mxu0 %vm144_vm3, %v2202_v26 }
 0x102   :  { %1565 = vmatprep.mubr.f32.mxu1 %v3602_v16  ;;  %1768 = vmatprep.mubr.f32.mxu0 %v3602_v16 }
 0x105   :  { %2193 = vmatmul.mubr.msk.f32.gmra.mxu1 %vm144_vm3, %v2185_v27  ;;  %2211 = vmatmul.mubr.msk.f32.gmra.mxu0 %vm144_vm3, %v2203_v28 }
 0x106   :  { %1571 = vmatprep.mubr.f32.mxu1 %v3602_v16  ;;  %1774 = vmatprep.mubr.f32.mxu0 %v3602_v16 }
 0x109   :  { %2194 = vmatmul.mubr.msk.f32.gmra.mxu1 %vm144_vm3, %v2186_v18  ;;  %2212 = vmatmul.mubr.msk.f32.gmra.mxu0 %vm144_vm3, %v2204_v22 }
 0x10a   :  { %1577 = vmatprep.mubr.f32.mxu1 %v3602_v16  ;;  %1780 = vmatprep.mubr.f32.mxu0 %v3602_v16 }
 0x10d   :  { %2195 = vmatmul.mubr.msk.f32.gmra.mxu1 %vm144_vm3, %v2187_v29  ;;  %2213 = vmatmul.mubr.msk.f32.gmra.mxu0 %vm144_vm3, %v2205_v9 }
 0x10e   :  { %1583 = vmatprep.mubr.f32.mxu1 %v3602_v16  ;;  %1786 = vmatprep.mubr.f32.mxu0 %v3602_v16 }
 0x111   :  { %2196 = vmatmul.mubr.msk.f32.gmra.mxu1 %vm144_vm3, %v2188_v30  ;;  %2214 = vmatmul.mubr.msk.f32.gmra.mxu0 %vm144_vm3, %v2206_v31 }
 0x112   :  { %1589 = vmatprep.mubr.f32.mxu1 %v3602_v16  ;;  %1792 = vmatprep.mubr.f32.mxu0 %v3602_v16 }
 0x115   :  { %2197 = vmatmul.mubr.msk.f32.gmra.mxu1 %vm144_vm3, %v2189_v1  ;;  %2215 = vmatmul.mubr.msk.f32.gmra.mxu0 %vm144_vm3, %v2207_v5 }
 0x148   :  { %v259_v11 = vpop.f32.mrf.mxu1 }
 0x149   :  { %v235_v13 = vpop.f32.mrf.mxu0 }
 0x14a   :  { %v261_v25 = vpop.f32.mrf.mxu1 }
 0x14b   :  { %v237_v34 = vpop.f32.mrf.mxu0 }
 0x14d   :  { %v265_v35 = vpop.f32.mrf.mxu1  ;;  %v241_v36 = vpop.f32.mrf.mxu0 }
 0x14f   :  { %v267_v37 = vpop.f32.mrf.mxu1  ;;  %v243_v38 = vpop.f32.mrf.mxu0 }
 0x151   :  { %v271_v40 = vpop.f32.mrf.mxu1  ;;  %v247_v7 = vpop.f32.mrf.mxu0 }
 0x153   :  { %v273_v10 = vpop.f32.mrf.mxu1  ;;  %v249_v47 = vpop.f32.mrf.mxu0 }
 0x155   :  { %v277_v41 = vpop.f32.mrf.mxu1  ;;  %v253_v42 = vpop.f32.mrf.mxu0 }
 0x157   :  { %v3276_v43 = vpop.f32.mrf.mxu1  ;;  %v255_v46 = vpop.f32.mrf.mxu0 }
 0x159   :  { %v372_v24 = vpop.f32.mrf.mxu1  ;;  %v559_v48 = vpop.f32.mrf.mxu0 }
 0x15a   :  { %v373_v49 = vadd.f32 %v372_v24, %v235_v13 }
 0x15b   :  { %v374_v45 = vpop.f32.mrf.mxu1  ;;  %v561_v50 = vpop.f32.mrf.mxu0 }
 0x15c   :  { %v3278_v21 = vadd.f32 %v559_v48, %v373_v49  ;;  %v375_v32 = vadd.f32 %v374_v45, %v237_v34 }
 0x15d   :  { %v378_v33 = vpop.f32.mrf.mxu1  ;;  %v565_v52 = vpop.f32.mrf.mxu0 }
 0x15e   :  { %v3280_v53 = vadd.f32 %v561_v50, %v375_v32  ;;  %v379_v4 = vadd.f32 %v378_v33, %v241_v36 }
 0x15f   :  { %v380_v56 = vpop.f32.mrf.mxu1  ;;  %v567_v57 = vpop.f32.mrf.mxu0 }
 0x160   :  { %v3282_v58 = vadd.f32 %v565_v52, %v379_v4  ;;  %v381_v54 = vadd.f32 %v380_v56, %v243_v38 }
 0x161   :  { %v384_v55 = vpop.f32.mrf.mxu1  ;;  %v571_v0 = vpop.f32.mrf.mxu0 }
 0x162   :  { %v3284_v3 = vadd.f32 %v567_v57, %v381_v54  ;;  %v385_v60 = vadd.f32 %v384_v55, %v247_v7 }
 0x163   :  { %v386_v61 = vpop.f32.mrf.mxu1  ;;  %v573_v19 = vpop.f32.mrf.mxu0 }
 0x164   :  { %v3286_v44 = vadd.f32 %v571_v0, %v385_v60  ;;  %v387_v51 = vadd.f32 %v386_v61, %v249_v47 }
 0x165   :  { %v390_v59 = vpop.f32.mrf.mxu1  ;;  %v577_v62 = vpop.f32.mrf.mxu0 }
 0x166   :  { %v3288_v63 = vadd.f32 %v573_v19, %v387_v51  ;;  %v391_v12 = vadd.f32 %v390_v59, %v253_v42 }
 0x167   :  { %v392_v14 = vpop.f32.mrf.mxu1  ;;  %v579_v15 = vpop.f32.mrf.mxu0 }
 0x168   :  { %v3290_v17 = vadd.f32 %v577_v62, %v391_v12  ;;  %v393_v20 = vadd.f32 %v392_v14, %v255_v46 }
 0x169   :  { %v396_v23 = vpop.f32.mrf.mxu1  ;;  %v583_v2 = vpop.f32.mrf.mxu0 }
 0x16a   :  { %v3292_v6 = vadd.f32 %v579_v15, %v393_v20  ;;  %v397_v8 = vadd.f32 %v396_v23, %v259_v11 }
 0x16b   :  { %v398_v39 = vpop.f32.mrf.mxu1  ;;  %v585_v26 = vpop.f32.mrf.mxu0 }
 0x16c   :  { %v3294_v27 = vadd.f32 %v583_v2, %v397_v8  ;;  %v399_v28 = vadd.f32 %v398_v39, %v261_v25 }
 0x16d   :  { %v402_v18 = vpop.f32.mrf.mxu1  ;;  %v589_v22 = vpop.f32.mrf.mxu0 }
 0x16e   :  { %v3296_v29 = vadd.f32 %v585_v26, %v399_v28  ;;  %v403_v9 = vadd.f32 %v402_v18, %v265_v35 }
 0x16f   :  { %v404_v30 = vpop.f32.mrf.mxu1  ;;  %v591_v31 = vpop.f32.mrf.mxu0 }
 0x170   :  { %v3298_v1 = vadd.f32 %v589_v22, %v403_v9  ;;  %v405_v5 = vadd.f32 %v404_v30, %v267_v37 }
 0x171   :  { %v408_v13 = vpop.f32.mrf.mxu1  ;;  %v595_v34 = vpop.f32.mrf.mxu0 }
 0x172   :  { %v3300_v36 = vadd.f32 %v591_v31, %v405_v5  ;;  %v409_v11 = vadd.f32 %v408_v13, %v271_v40 }
 0x173   :  { %v410_v38 = vpop.f32.mrf.mxu1  ;;  %v597_v7 = vpop.f32.mrf.mxu0 }
 0x174   :  { %v3302_v47 = vadd.f32 %v595_v34, %v409_v11  ;;  %v411_v25 = vadd.f32 %v410_v38, %v273_v10 }
 0x175   :  { %v414_v42 = vpop.f32.mrf.mxu1  ;;  %v601_v46 = vpop.f32.mrf.mxu0 }
 0x176   :  { %v3304_v24 = vadd.f32 %v597_v7, %v411_v25  ;;  %v415_v35 = vadd.f32 %v414_v42, %v277_v41 }
 0x177   :  { %v416_v48 = vpop.f32.mrf.mxu1  ;;  %v603_v49 = vpop.f32.mrf.mxu0 }
 0x178   :  { %v3306_v45 = vadd.f32 %v601_v46, %v415_v35  ;;  %v417_v37 = vadd.f32 %v416_v48, %v3276_v43 }
 0x179   :  { %v762_v50 = vpop.f32.mrf.mxu1  ;;  %v940_v32 = vpop.f32.mrf.mxu0 }
 0x17a   :  { %3604 = vst [vmem:[#allocation2_spill] sm:$0xff] %v3306_v45  ;;  %v3309_v33 = vadd.f32 %v603_v49, %v417_v37 }
 0x17b   :  { %v764_v40 = vpop.f32.mrf.mxu1  ;;  %v942_v52 = vpop.f32.mrf.mxu0 }
 0x17c   :  { %3605 = vst [vmem:[#allocation3_spill] sm:$0xff] %v3309_v33 }
 0x17d   :  { %v768_v4 = vpop.f32.mrf.mxu1  ;;  %v3311_v56 = vpop.f32.mrf.mxu0 }
 0x17f   :  { %v770_v10 = vpop.f32.mrf.mxu1  ;;  %v3313_v57 = vpop.f32.mrf.mxu0 }
 0x181   :  { %v774_v54 = vpop.f32.mrf.mxu1  ;;  %v3315_v41 = vpop.f32.mrf.mxu0 }
 0x183   :  { %v776_v55 = vpop.f32.mrf.mxu1  ;;  %v3317_v0 = vpop.f32.mrf.mxu0 }
 0x185   :  { %v780_v60 = vpop.f32.mrf.mxu1  ;;  %v3319_v43 = vpop.f32.mrf.mxu0 }
 0x187   :  { %v782_v61 = vpop.f32.mrf.mxu1  ;;  %v3321_v19 = vpop.f32.mrf.mxu0 }
 0x189   :  { %v786_v51 = vpop.f32.mrf.mxu1  ;;  %v3323_v59 = vpop.f32.mrf.mxu0 }
 0x18b   :  { %v3325_v62 = vpop.f32.mrf.mxu1  ;;  %v3327_v12 = vpop.f32.mrf.mxu0 }
 0x18d   :  { %v3329_v14 = vpop.f32.mrf.mxu1  ;;  %v3331_v15 = vpop.f32.mrf.mxu0 }
 0x18f   :  { %v3333_v20 = vpop.f32.mrf.mxu1  ;;  %v3335_v23 = vpop.f32.mrf.mxu0 }
 0x191   :  { %v3337_v2 = vpop.f32.mrf.mxu1  ;;  %v3339_v8 = vpop.f32.mrf.mxu0 }
 0x193   :  { %v3341_v39 = vpop.f32.mrf.mxu1  ;;  %v3343_v26 = vpop.f32.mrf.mxu0 }
 0x194   :  { %3606 = vst [vmem:[#allocation4_spill] sm:$0xff] %v3343_v26 }
 0x195   :  { %v3345_v28 = vpop.f32.mrf.mxu1  ;;  %v3347_v18 = vpop.f32.mrf.mxu0 }
 0x196   :  { %3607 = vst [vmem:[#allocation5_spill] sm:$0xff] %v3345_v28  ;;  %3608 = vst [vmem:[#allocation6_spill] sm:$0xff] %v3347_v18 }
 0x197   :  { %v3349_v22 = vpop.f32.mrf.mxu1  ;;  %v3351_v9 = vpop.f32.mrf.mxu0 }
 0x198   :  { %3609 = vst [vmem:[#allocation7_spill] sm:$0xff] %v3349_v22  ;;  %3610 = vst [vmem:[#allocation8_spill] sm:$0xff] %v3351_v9 }
 0x199   :  { %v1143_v30 = vpop.f32.mrf.mxu1  ;;  %v1346_v31 = vpop.f32.mrf.mxu0 }
 0x19b   :  { %v1145_v5 = vpop.f32.mrf.mxu1  ;;  %v1348_v13 = vpop.f32.mrf.mxu0 }
 0x19d   :  { %v1149_v34 = vpop.f32.mrf.mxu1  ;;  %v1352_v11 = vpop.f32.mrf.mxu0 }
 0x19f   :  { %v1151_v38 = vpop.f32.mrf.mxu1  ;;  %v3353_v7 = vpop.f32.mrf.mxu0 }
 0x1a1   :  { %v1155_v25 = vpop.f32.mrf.mxu1  ;;  %v3355_v42 = vpop.f32.mrf.mxu0 }
 0x1a3   :  { %v3357_v46 = vpop.f32.mrf.mxu1  ;;  %v3359_v35 = vpop.f32.mrf.mxu0 }
 0x1a4   :  { %3611 = vst [vmem:[#allocation9_spill] sm:$0xff] %v3359_v35  ;;  %v809_v35 = vadd.f32 %v762_v50, %v3278_v21  ;;  %v812_v21 = vadd.f32 %v770_v10, %v3284_v3 }
 0x1a5   :  { %v3361_v48 = vpop.f32.mrf.mxu1  ;;  %v3363_v49 = vpop.f32.mrf.mxu0 }
 0x1a6   :  { %3612 = vst [vmem:[#allocation10_spill] sm:$0xff] %v3363_v49  ;;  %v990_v3 = vadd.f32 %v3313_v57, %v812_v21  ;;  %v3625_v21 = vld [vmem:[#allocation2_spill] sm:$0xff] }
 0x1a7   :  { %v3365_v37 = vpop.f32.mrf.mxu1  ;;  %v3367_v16 = vpop.f32.mrf.mxu0 }
 0x1a8   :  { %3613 = vst [vmem:[#allocation11_spill] sm:$0xff] %v3365_v37  ;;  %3614 = vst [vmem:[#allocation12_spill] sm:$0xff] %v3367_v16  ;;  %v810_v16 = vadd.f32 %v764_v40, %v3280_v53  ;;  %v1193_v57 = vadd.f32 %v1151_v38, %v990_v3 }
 0x1a9   :  { %v3369_v9 = vpop.f32.mrf.mxu1  ;;  %v3371_v22 = vpop.f32.mrf.mxu0 }
 0x1aa   :  { %3615 = vst [vmem:[#allocation13_spill] sm:$0xff] %v3369_v9  ;;  %3616 = vst [vmem:[#allocation14_spill] sm:$0xff] %v3371_v22  ;;  %v987_v22 = vadd.f32 %v940_v32, %v809_v35  ;;  %v816_v35 = vadd.f32 %v782_v61, %v3292_v6  ;;  %v819_v6 = vadd.f32 %v3329_v14, %v3298_v1 }
 0x1ab   :  { %v3373_v33 = vpop.f32.mrf.mxu1  ;;  %v3375_v18 = vpop.f32.mrf.mxu0 }
 0x1ac   :  { %3617 = vst [vmem:[#allocation15_spill] sm:$0xff] %v3373_v33  ;;  %3618 = vst [vmem:[#allocation16_spill] sm:$0xff] %v3375_v18  ;;  %v811_v33 = vadd.f32 %v768_v4, %v3282_v58  ;;  %v1190_v50 = vadd.f32 %v1143_v30, %v987_v22  ;;  %v815_v58 = vadd.f32 %v780_v60, %v3290_v17  ;;  %v1831_v22 = vpop.permute.xlu1 %1830 }
 0x1ad   :  { %v3377_v28 = vpop.f32.mrf.mxu1  ;;  %v3379_v45 = vpop.f32.mrf.mxu0  ;;  %v818_v17 = vadd.f32 %v3325_v62, %v3296_v29  ;;  %v994_v61 = vadd.f32 %v3321_v19, %v816_v35  ;;  %v822_v19 = vadd.f32 %v3341_v39, %v3304_v24 }
 0x1ae   :  { %3619 = vst [vmem:[#allocation17_spill] sm:$0xff] %v3377_v28  ;;  %3620 = vst [vmem:[#allocation18_spill] sm:$0xff] %v3379_v45  ;;  %v988_v45 = vadd.f32 %v942_v52, %v810_v16  ;;  %v989_v32 = vadd.f32 %v3311_v56, %v811_v33  ;;  %v993_v56 = vadd.f32 %v3319_v43, %v815_v58 }
 0x1af   :  { %v3382_v26 = vpop.f32.mrf.mxu1  ;;  %v3384_v49 = vpop.f32.mrf.mxu0  ;;  %v996_v30 = vadd.f32 %v3327_v12, %v818_v17  ;;  %v3628_v58 = vld [vmem:[#allocation11_spill] sm:$0xff] }
 0x1b0   :  { %3621 = vst [vmem:[#allocation19_spill] sm:$0xff] %v3382_v26  ;;  %3622 = vst [vmem:[#allocation20_spill] sm:$0xff] %v3384_v49  ;;  %v813_v26 = vadd.f32 %v774_v54, %v3286_v44  ;;  %v814_v49 = vadd.f32 %v776_v55, %v3288_v63  ;;  %v1191_v4 = vadd.f32 %v1145_v5, %v988_v45 }
 0x1b1   :  { %v3387_v37 = vpop.f32.mrf.mxu1  ;;  %v3389_v9 = vpop.f32.mrf.mxu0  ;;  %v817_v44 = vadd.f32 %v786_v51, %v3294_v27  ;;  %v1393_v63 = vadd.f32 %v1346_v31, %v1190_v50  ;;  %v1192_v52 = vadd.f32 %v1149_v34, %v989_v32  ;;  %v997_v31 = vadd.f32 %v3331_v15, %v819_v6 }
 0x1b2   :  { %v991_v10 = vadd.f32 %v3315_v41, %v813_v26  ;;  %v992_v54 = vadd.f32 %v3317_v0, %v814_v49  ;;  %v1394_v55 = vadd.f32 %v1348_v13, %v1191_v4  ;;  %v1826_v27 = vpop.permute.xlu0 %1825  ;;  %v820_v41 = vadd.f32 %v3333_v20, %v3300_v36 }
 0x1b3   :  { %v3392_v18 = vpop.f32.mrf.mxu1  ;;  %v3394_v28 = vpop.f32.mrf.mxu0  ;;  %v821_v0 = vadd.f32 %v3337_v2, %v3302_v47  ;;  %v995_v1 = vadd.f32 %v3323_v59, %v817_v44  ;;  %v1395_v14 = vadd.f32 %v1352_v11, %v1192_v52  ;;  %v1396_v2 = vadd.f32 %v3353_v7, %v1193_v57  ;;  %v3624_v7 = vld [vmem:[#allocation4_spill] sm:$0xff]  ;;  %v3629_v52 = vld [vmem:[#allocation10_spill] sm:$0xff] }
 0x1b4   :  { %3623 = vst [vmem:[#allocation21_spill] sm:$0xff] %v3394_v28  ;;  %v1194_v29 = vadd.f32 %v1155_v25, %v991_v10  ;;  %v1195_v36 = vadd.f32 %v3357_v46, %v992_v54  ;;  %v998_v34 = vadd.f32 %v3335_v23, %v820_v41  ;;  %v1196_v15 = vadd.f32 %v3361_v48, %v993_v56  ;;  %v3626_v23 = vld [vmem:[#allocation5_spill] sm:$0xff]  ;;  %v3632_v41 = vld [vmem:[#allocation6_spill] sm:$0xff] }
 0x1b5   :  { %v3399_v53 = vpop.f32.mrf.mxu1  ;;  %v3401_v40 = vpop.f32.mrf.mxu0  ;;  %v3435_v11 = vadd.f32 %v3339_v8, %v821_v0  ;;  %v3443_v49 = vadd.f32 %v3624_v7, %v822_v19  ;;  %v823_v50 = vadd.f32 %v3626_v23, %v3625_v21  ;;  %v3627_v8 = vld [vmem:[#allocation9_spill] sm:$0xff]  ;;  %v3637_v7 = vld [vmem:[#allocation3_spill] sm:$0xff] }
 0x1b6   :  { %v1397_v12 = vadd.f32 %v3355_v42, %v1194_v29  ;;  %v1398_v32 = vadd.f32 %v3627_v8, %v1195_v36  ;;  %v1197_v42 = vadd.f32 %v3628_v58, %v994_v61  ;;  %v1399_v10 = vadd.f32 %v3629_v52, %v1196_v15  ;;  %v3630_v54 = vld [vmem:[#allocation13_spill] sm:$0xff]  ;;  %v3633_v29 = vld [vmem:[#allocation12_spill] sm:$0xff]  ;;  %v3638_v21 = vld [vmem:[#allocation7_spill] sm:$0xff] }
 0x1b7   :  { %v3406_v28 = vpop.f32.mrf.mxu1  ;;  %v3408_v16 = vpop.f32.mrf.mxu0  ;;  %v1198_v17 = vadd.f32 %v3630_v54, %v995_v1  ;;  %v1001_v0 = vadd.f32 %v3632_v41, %v823_v50  ;;  %v824_v23 = vadd.f32 %v3638_v21, %v3637_v7  ;;  %v3639_v50 = vld [vmem:[#allocation16_spill] sm:$0xff]  ;;  %v1202_v52 = vadd.f32 %v3387_v37, %v3435_v11 }
 0x1b8   :  { %v3643_v41 = vld [vmem:[#allocation20_spill] sm:$0xff] }
 0x1b9   :  { %v1549_v45 = vpop.f32.mrf.mxu1  ;;  %v1752_v33 = vpop.f32.mrf.mxu0 }
 0x1ba   :  { %v1596_v60 = vadd.f32 %v1549_v45, %v1393_v63  ;;  %v1836_v63 = vpop.permute.xlu1 %1835 }
 0x1bb   :  { %v1551_v51 = vpop.f32.mrf.mxu1  ;;  %v1754_v62 = vpop.f32.mrf.mxu0 }
 0x1bc   :  { %v1799_v26 = vadd.f32 %v1752_v33, %v1596_v60  ;;  %v1597_v43 = vadd.f32 %v1551_v51, %v1394_v55  ;;  %v3631_v33 = vmov 0.0   ;;  %v1400_v51 = vadd.f32 %v3633_v29, %v1197_v42 }
 0x1bd   :  { %v1555_v20 = vpop.f32.mrf.mxu1  ;;  %v1758_v47 = vpop.f32.mrf.mxu0 }
 0x1be   :  { %v1800_v5 = vadd.f32 %v1754_v62, %v1597_v43  ;;  %v3431_v13 = vadd.f32 %v1826_v27, %v1799_v26  ;;  %v1598_v59 = vadd.f32 %v1555_v20, %v1395_v14  ;;  %v3634_v62 = vld [vmem:[#allocation15_spill] sm:$0xff] }
 0x1bf   :  { %v1557_v24 = vpop.f32.mrf.mxu1  ;;  %v1760_v39 = vpop.f32.mrf.mxu0  ;;  %v1199_v14 = vadd.f32 %v3634_v62, %v996_v30 }
 0x1c0   :  { %v3439_v38 = vadd.f32 %v1826_v27, %v1800_v5  ;;  %v1801_v25 = vadd.f32 %v1758_v47, %v1598_v59  ;;  %v1599_v46 = vadd.f32 %v1557_v24, %v1396_v2  ;;  %vm1879_vm9 = vcmp.gt.f32.partialorder %v3431_v13, 0.0  ;;  %v3636_v47 = vld [vmem:[#allocation17_spill] sm:$0xff] }
 0x1c1   :  { %v1561_v4 = vpop.f32.mrf.mxu1  ;;  %v1764_v48 = vpop.f32.mrf.mxu0  ;;  %v2216_v56 = vsel %vm1879_vm9, 1.0, %v3631_v33  ;;  %v1200_v2 = vadd.f32 %v3636_v47, %v997_v31  ;;  %v1402_v8 = vadd.f32 %v3639_v50, %v1199_v14  ;;  %vm2048_vm9 = vcmask 7168  }
 0x1c2   :  { %v1802_v35 = vadd.f32 %v1760_v39, %v1599_v46  ;;  %v3449_v3 = vadd.f32 %v1831_v22, %v1801_v25  ;;  %v1600_v44 = vadd.f32 %v1561_v4, %v1397_v12  ;;  %vm1880_vm10 = vcmp.gt.f32.partialorder %v3439_v38, 0.0  ;;  %v1841_v25 = vpop.permute.xlu0 %1840 }
 0x1c3   :  { %v1563_v6 = vpop.f32.mrf.mxu1  ;;  %v1766_v45 = vpop.f32.mrf.mxu0  ;;  %v2217_v55 = vsel %vm1880_vm10, 1.0, %v3631_v33 }
 0x1c4   :  { %v3458_v57 = vadd.f32 %v1831_v22, %v1802_v35  ;;  %v1803_v60 = vadd.f32 %v1764_v48, %v1600_v44  ;;  %v1601_v27 = vadd.f32 %v1563_v6, %v1398_v32  ;;  %v1935_v61 = vadd.f32 %v2217_v55, %v2216_v56  ;;  %v3635_v22 = vld [vmem:[#allocation14_spill] sm:$0xff]  ;;  %v3640_v32 = vld [vmem:[#allocation19_spill] sm:$0xff] }
 0x1c5   :  { %v1567_v1 = vpop.f32.mrf.mxu1  ;;  %v1770_v26 = vpop.f32.mrf.mxu0  ;;  %vm1881_vm11 = vcmp.gt.f32.partialorder %v3449_v3, 0.0  ;;  %v1401_v20 = vadd.f32 %v3635_v22, %v1198_v17  ;;  %v1201_v58 = vadd.f32 %v3640_v32, %v998_v34  ;;  %v3641_v44 = vld [vmem:[#allocation18_spill] sm:$0xff] }
 0x1c6   :  { %v1804_v43 = vadd.f32 %v1766_v45, %v1601_v27  ;;  %v3464_v19 = vadd.f32 %v1836_v63, %v1803_v60  ;;  %v1602_v36 = vadd.f32 %v1567_v1, %v1399_v10  ;;  %1936 = vadd.xlane.f32.xlu1 %v1935_v61  ;;  %vm1882_vm12 = vcmp.gt.f32.partialorder %v3458_v57, 0.0  ;;  %v1846_v45 = vpop.permute.xlu1 %1845  ;;  %v3642_v27 = vld [vmem:[#allocation8_spill] sm:$0xff] }
 0x1c7   :  { %v1569_v5 = vpop.f32.mrf.mxu1  ;;  %v1772_v59 = vpop.f32.mrf.mxu0  ;;  %v2218_v12 = vsel %vm1881_vm11, 1.0, %v3631_v33  ;;  %v2219_v30 = vsel %vm1882_vm12, 1.0, %v3631_v33  ;;  %v1002_v61 = vadd.f32 %v3642_v27, %v824_v23  ;;  %v1404_v29 = vadd.f32 %v3643_v41, %v1201_v58 }
 0x1c8   :  { %v3471_v15 = vadd.f32 %v1836_v63, %v1804_v43  ;;  %v1805_v24 = vadd.f32 %v1770_v26, %v1602_v36  ;;  %v1603_v39 = vadd.f32 %v1569_v5, %v1400_v51  ;;  %v1938_v46 = vadd.f32 %v2219_v30, %v2218_v12  ;;  %v3644_v12 = vld [vmem:[#allocation21_spill] sm:$0xff] }
 0x1c9   :  { %v1573_v31 = vpop.f32.mrf.mxu1  ;;  %v1776_v42 = vpop.f32.mrf.mxu0  ;;  %vm1883_vm13 = vcmp.gt.f32.partialorder %v3464_v19, 0.0  ;;  %v1403_v63 = vadd.f32 %v3641_v44, %v1200_v2  ;;  %v1203_v51 = vadd.f32 %v3392_v18, %v3443_v49  ;;  %v1405_v26 = vadd.f32 %v3389_v9, %v1202_v52 }
 0x1ca   :  { %v3478_v4 = vadd.f32 %v1841_v25, %v1805_v24  ;;  %v1806_v48 = vadd.f32 %v1772_v59, %v1603_v39  ;;  %v1604_v35 = vadd.f32 %v1573_v31, %v1401_v20  ;;  %1939 = vadd.xlane.f32.xlu0 %v1938_v46  ;;  %vm1884_vm14 = vcmp.gt.f32.partialorder %v3471_v15, 0.0  ;;  %v1851_v49 = vpop.permute.xlu0 %1850 }
 0x1cb   :  { %v1575_v10 = vpop.f32.mrf.mxu1  ;;  %v1778_v54 = vpop.f32.mrf.mxu0  ;;  %v2220_v34 = vsel %vm1883_vm13, 1.0, %v3631_v33  ;;  %v2221_v17 = vsel %vm1884_vm14, 1.0, %v3631_v33  ;;  %v1204_v43 = vadd.f32 %v3399_v53, %v1001_v0  ;;  %v1406_v30 = vadd.f32 %v3644_v12, %v1203_v51  ;;  %v1931_v12 = vld [vmem:[%s3596_s3 + $0x20] sm:$0xff] }
 0x1cc   :  { %v3486_v6 = vadd.f32 %v1841_v25, %v1806_v48  ;;  %v1807_v56 = vadd.f32 %v1776_v42, %v1604_v35  ;;  %v1605_v55 = vadd.f32 %v1575_v10, %v1402_v8  ;;  %v1941_v60 = vadd.f32 %v2221_v17, %v2220_v34 }
 0x1cd   :  { %v1579_v37 = vpop.f32.mrf.mxu1  ;;  %v1782_v11 = vpop.f32.mrf.mxu0  ;;  %vm1885_vm15 = vcmp.gt.f32.partialorder %v3478_v4, 0.0  ;;  %v1205_v24 = vadd.f32 %v3406_v28, %v1002_v61  ;;  %v1407_v46 = vadd.f32 %v3401_v40, %v1204_v43 }
 0x1ce   :  { %v3493_v62 = vadd.f32 %v1846_v45, %v1807_v56  ;;  %v1808_v14 = vadd.f32 %v1778_v54, %v1605_v55  ;;  %v1606_v1 = vadd.f32 %v1579_v37, %v1403_v63  ;;  %1942 = vadd.xlane.f32.xlu0 %v1941_v60  ;;  %vm1886_vm0 = vcmp.gt.f32.partialorder %v3486_v6, 0.0  ;;  %v1856_v28 = vpop.permute.xlu1 %1855  ;;  %v1861_v56 = vpop.permute.xlu0 %1860 }
 0x1cf   :  { %v1581_v36 = vpop.f32.mrf.mxu1  ;;  %v1784_v22 = vpop.f32.mrf.mxu0  ;;  %v2222_v20 = vsel %vm1885_vm15, 1.0, %v3631_v33  ;;  %v2223_v18 = vsel %vm1886_vm0, 1.0, %v3631_v33  ;;  %v1408_v42 = vadd.f32 %v3408_v16, %v1205_v24 }
 0x1d0   :  { %v3500_v47 = vadd.f32 %v1846_v45, %v1808_v14  ;;  %v1809_v2 = vadd.f32 %v1782_v11, %v1606_v1  ;;  %v1607_v5 = vadd.f32 %v1581_v36, %v1404_v29  ;;  %v1944_v59 = vadd.f32 %v2223_v18, %v2222_v20  ;;  %v1927_v1 = vld [vmem:[%s3596_s3] sm:$0xff]  ;;  %v1928_v36 = vld [vmem:[%s3596_s3 + $0x8] sm:$0xff]  ;;  %v1929_v18 = vld [vmem:[%s3596_s3 + $0x10] sm:$0xff] }
 0x1d1   :  { %v1585_v39 = vpop.f32.mrf.mxu1  ;;  %v1788_v9 = vpop.f32.mrf.mxu0  ;;  %vm1887_vm1 = vcmp.gt.f32.partialorder %v3493_v62, 0.0 }
 0x1d2   :  { %v3505_v53 = vadd.f32 %v1851_v49, %v1809_v2  ;;  %v1810_v0 = vadd.f32 %v1784_v22, %v1607_v5  ;;  %v1608_v25 = vadd.f32 %v1585_v39, %v1405_v26  ;;  %1945 = vadd.xlane.f32.xlu1 %v1944_v59  ;;  %vm1888_vm2 = vcmp.gt.f32.partialorder %v3500_v47, 0.0  ;;  %v1930_v2 = vld [vmem:[%s3596_s3 + $0x18] sm:$0xff]  ;;  %v1932_v39 = vld [vmem:[%s3596_s3 + $0x28] sm:$0xff] }
 0x1d3   :  { %v1587_v7 = vpop.f32.mrf.mxu1  ;;  %v1790_v21 = vpop.f32.mrf.mxu0  ;;  %v2224_v23 = vsel %vm1887_vm1, 1.0, %v3631_v33  ;;  %v2225_v50 = vsel %vm1888_vm2, 1.0, %v3631_v33 }
 0x1d4   :  { %v3511_v8 = vadd.f32 %v1851_v49, %v1810_v0  ;;  %v1811_v32 = vadd.f32 %v1788_v9, %v1608_v25  ;;  %v1609_v58 = vadd.f32 %v1587_v7, %v1406_v30  ;;  %v1947_v31 = vadd.f32 %v2225_v50, %v2224_v23  ;;  %v1933_v25 = vld [vmem:[%s3596_s3 + $0x30] sm:$0xff] }
 0x1d5   :  { %v1591_v48 = vpop.f32.mrf.mxu1  ;;  %v1794_v35 = vpop.f32.mrf.mxu0  ;;  %vm1889_vm3 = vcmp.gt.f32.partialorder %v3505_v53, 0.0 }
 0x1d6   :  { %v3515_v44 = vadd.f32 %v1856_v28, %v1811_v32  ;;  %v1812_v40 = vadd.f32 %v1790_v21, %v1609_v58  ;;  %v1610_v63 = vadd.f32 %v1591_v48, %v1407_v46  ;;  %1948 = vadd.xlane.f32.xlu0 %v1947_v31  ;;  %vm1890_vm4 = vcmp.gt.f32.partialorder %v3511_v8, 0.0  ;;  %v1934_v21 = vld [vmem:[%s3596_s3 + $0x38] sm:$0xff] }
 0x1d7   :  { %v1593_v52 = vpop.f32.mrf.mxu1  ;;  %v2226_v10 = vsel %vm1889_vm3, 1.0, %v3631_v33  ;;  %v2227_v54 = vsel %vm1890_vm4, 1.0, %v3631_v33  ;;  %v1796_v55 = vpop.f32.mrf.mxu0 }
 0x1d8   :  { %v3520_v34 = vadd.f32 %v1856_v28, %v1812_v40  ;;  %v1813_v17 = vadd.f32 %v1794_v35, %v1610_v63  ;;  %v1611_v16 = vadd.f32 %v1593_v52, %v1408_v42  ;;  %v1950_v45 = vadd.f32 %v2227_v54, %v2226_v10 }
 0x1d9   :  { %vm1891_vm5 = vcmp.gt.f32.partialorder %v3515_v44, 0.0 }
 0x1da   :  { %v3523_v60 = vadd.f32 %v1861_v56, %v1813_v17  ;;  %v1814_v27 = vadd.f32 %v1796_v55, %v1611_v16  ;;  %1951 = vadd.xlane.f32.xlu1 %v1950_v45  ;;  %vm1892_vm6 = vcmp.gt.f32.partialorder %v3520_v34, 0.0  ;;  %v2228_v61 = vsel %vm1891_vm5, 1.0, %v3631_v33 }
 0x1db   :  { %v2229_v41 = vsel %vm1892_vm6, 1.0, %v3631_v33 }
 0x1dc   :  { %v3528_v29 = vadd.f32 %v1861_v56, %v1814_v27  ;;  %v1953_v51 = vadd.f32 %v2229_v41, %v2228_v61  ;;  %vm1893_vm7 = vcmp.gt.f32.partialorder %v3523_v60, 0.0 }
 0x1dd   :  { %v2230_v37 = vsel %vm1893_vm7, 1.0, %v3631_v33 }
 0x1de   :  { %1954 = vadd.xlane.f32.xlu0 %v1953_v51  ;;  %vm1894_vm8 = vcmp.gt.f32.partialorder %v3528_v29, 0.0 }
 0x1df   :  { %v2231_v11 = vsel %vm1894_vm8, 1.0, %v3631_v33 }
 0x1e0   :  { %v1956_v14 = vadd.f32 %v2231_v11, %v2230_v37 }
 0x1e2   :  { %1957 = vadd.xlane.f32.xlu1 %v1956_v14 }
 0x24f   :  { %v1937_v26 = vpop.xlane.xlu1 %1936 }
 0x250   :  { %v1959_v43 = vmul.f32 %v1937_v26, %v1927_v1 }
 0x252   :  { %1969 = vperm.xlu0 %2410, %v1959_v43  }
 0x253   :  { %v1940_v22 = vpop.xlane.xlu0 %1939 }
 0x254   :  { %v1960_v20 = vmul.f32 %v1940_v22, %v1928_v36 }
 0x256   :  { %1974 = vperm.xlu1 %2411, %v1960_v20  }
 0x257   :  { %v1943_v33 = vpop.xlane.xlu0 %1942 }
 0x258   :  { %v1961_v49 = vmul.f32 %v1943_v33, %v1929_v18 }
 0x25a   :  { %1979 = vperm.xlu1 %2411, %v1961_v49  }
 0x25b   :  { %v1946_v5 = vpop.xlane.xlu1 %1945 }
 0x25c   :  { %v1962_v59 = vmul.f32 %v1946_v5, %v1930_v2 }
 0x25e   :  { %1984 = vperm.xlu0 %2410, %v1962_v59  }
 0x25f   :  { %v1949_v30 = vpop.xlane.xlu0 %1948 }
 0x260   :  { %v1963_v24 = vmul.f32 %v1949_v30, %v1931_v12 }
 0x262   :  { %1989 = vperm.xlu1 %2411, %v1963_v24  }
 0x263   :  { %v1952_v9 = vpop.xlane.xlu1 %1951 }
 0x264   :  { %v1964_v0 = vmul.f32 %v1952_v9, %v1932_v39 }
 0x266   :  { %1994 = vperm.xlu0 %2410, %v1964_v0  }
 0x267   :  { %v1955_v46 = vpop.xlane.xlu0 %1954 }
 0x268   :  { %v1965_v7 = vmul.f32 %v1955_v46, %v1933_v25 }
 0x26a   :  { %1999 = vperm.xlu1 %2411, %v1965_v7  }
 0x26b   :  { %v1958_v23 = vpop.xlane.xlu1 %1957 }
 0x26c   :  { %v1966_v50 = vmul.f32 %v1958_v23, %v1934_v21 }
 0x26e   :  { %2004 = vperm.xlu0 %2410, %v1966_v50  }
 0x2cd   :  { %v1970_v32 = vpop.permute.xlu0 %1969 }
 0x2ce   :  { %v2007_v35 = vmul.f32 %v1970_v32, %v3431_v13  ;;  %v2008_v40 = vmul.f32 %v1970_v32, %v3439_v38 }
 0x2d1   :  { %v1975_v28 = vpop.permute.xlu1 %1974 }
 0x2d2   :  { %v2009_v31 = vmul.f32 %v1975_v28, %v3449_v3  ;;  %v2010_v42 = vmul.f32 %v1975_v28, %v3458_v57 }
 0x2d4   :  { %v2023_v54 = vadd.f32 %v2009_v31, %v2007_v35  ;;  %v2024_v17 = vadd.f32 %v2010_v42, %v2008_v40 }
 0x2d5   :  { %v1980_v58 = vpop.permute.xlu1 %1979 }
 0x2d6   :  { %v2011_v63 = vmul.f32 %v1980_v58, %v3464_v19  ;;  %v2012_v52 = vmul.f32 %v1980_v58, %v3471_v15 }
 0x2d8   :  { %v2025_v3 = vadd.f32 %v2023_v54, %v2011_v63  ;;  %v2026_v55 = vadd.f32 %v2024_v17, %v2012_v52 }
 0x2d9   :  { %v1985_v48 = vpop.permute.xlu0 %1984 }
 0x2da   :  { %v2013_v16 = vmul.f32 %v1985_v48, %v3478_v4  ;;  %v2014_v45 = vmul.f32 %v1985_v48, %v3486_v6 }
 0x2dc   :  { %v2027_v27 = vadd.f32 %v2025_v3, %v2013_v16  ;;  %v2028_v38 = vadd.f32 %v2026_v55, %v2014_v45 }
 0x2dd   :  { %v1990_v10 = vpop.permute.xlu1 %1989 }
 0x2de   :  { %v2015_v57 = vmul.f32 %v1990_v10, %v3493_v62  ;;  %v2016_v13 = vmul.f32 %v1990_v10, %v3500_v47 }
 0x2e0   :  { %v2029_v41 = vadd.f32 %v2027_v27, %v2015_v57  ;;  %v2030_v51 = vadd.f32 %v2028_v38, %v2016_v13 }
 0x2e1   :  { %v1995_v56 = vpop.permute.xlu0 %1994 }
 0x2e2   :  { %v2017_v19 = vmul.f32 %v1995_v56, %v3505_v53  ;;  %v2018_v15 = vmul.f32 %v1995_v56, %v3511_v8  ;;  %v2039_v8 = vld [vmem:[%s3597_s5] sm:$0xff] }
 0x2e4   :  { %v2031_v37 = vadd.f32 %v2029_v41, %v2017_v19  ;;  %v2032_v11 = vadd.f32 %v2030_v51, %v2018_v15 }
 0x2e5   :  { %v2000_v61 = vpop.permute.xlu1 %1999 }
 0x2e6   :  { %v2019_v4 = vmul.f32 %v2000_v61, %v3515_v44  ;;  %v2020_v6 = vmul.f32 %v2000_v61, %v3520_v34  ;;  %v2040_v44 = vld [vmem:[%s3597_s5 + $0x8] sm:$0xff] }
 0x2e8   :  { %v2033_v1 = vadd.f32 %v2031_v37, %v2019_v4  ;;  %v2034_v62 = vadd.f32 %v2032_v11, %v2020_v6 }
 0x2e9   :  { %v2005_v14 = vpop.permute.xlu0 %2004 }
 0x2ea   :  { %v2021_v47 = vmul.f32 %v2005_v14, %v3523_v60  ;;  %v2022_v26 = vmul.f32 %v2005_v14, %v3528_v29 }
 0x2ec   :  { %v2035_v43 = vadd.f32 %v2033_v1, %v2021_v47  ;;  %v2036_v53 = vadd.f32 %v2034_v62, %v2022_v26 }
 0x2ee   :  { %v2037_v34 = vmax.f32 %v2035_v43, 0.0  ;;  %v2038_v36 = vmax.f32 %v2036_v53, 0.0 }
 0x2f0   :  { %v2041_v22 = vmul.f32 %v2039_v8, %v2037_v34  ;;  %v2042_v20 = vmul.f32 %v2040_v44, %v2038_v36  ;;  %v2054_v29 = vmin.f32 %v2037_v34, %v2038_v36  ;;  %v2058_v2 = vmax.f32 %v2037_v34, %v2038_v36 }
 0x2f2   :  { %v2050_v18 = vadd.f32 %v2042_v20, %v2041_v22  ;;  %v2043_v33 = vmul.f32 %v2041_v22, %v2037_v34  ;;  %v2044_v49 = vmul.f32 %v2042_v20, %v2038_v36 }
 0x2f4   :  { %2051 = vadd.xlane.f32.xlu0 %v2050_v18  ;;  %v2045_v60 = vadd.f32 %v2044_v49, %v2043_v33 }
 0x2f6   :  { %2046 = vadd.xlane.f32.xlu1 %v2045_v60 }
 0x2f8   :  { %2055 = vmin.xlane.f32.xlu0 %v2054_v29 }
 0x2fa   :  { %2059 = vmax.xlane.f32.xlu1 %v2058_v2 }
 0x37d   :  { %v2052_v5 = vpop.xlane.xlu0 %2051 }
 0x37e   :  { %2053 = vst.msk [vmem:[%s3598_s7] sm:$0xff] %vm2048_vm9, %v2052_v5 }
 0x37f   :  { %v2047_v59 = vpop.xlane.xlu1 %2046 }
 0x380   :  { %2049 = vst.msk [vmem:[%s3599_s6] sm:$0xff] %vm2048_vm9, %v2047_v59 }
 0x381   :  { %v2056_v12 = vpop.xlane.xlu0 %2055 }
 0x382   :  { %2057 = vst.msk [vmem:[%s3600_s8] sm:$0xff] %vm2048_vm9, %v2056_v12 }
 0x383   :  { %v2060_v30 = vpop.xlane.xlu1 %2059 }
 0x384   :  { %2061 = vst.msk [vmem:[%s3601_s9] sm:$0xff] %vm2048_vm9, %v2060_v30 }

</bundles_post_ra>
